<compile_context>
chip_gen: v7x
topology: tpu7x:2x2x1
jax: 0.10.0
libtpu: 0.0.40
codegen_flags: <defaults>
</compile_context>

<pallas_src>
import functools
import math

import jax
import jax.numpy as jnp
from jax import lax
from jax.experimental import pallas as pl
from jax.experimental.pallas import tpu as pltpu


# ----------------------------- shared math --------------------------------- #

def _layernorm(x, gamma, beta, eps=1e-8):
    mean = jnp.mean(x, axis=-1, keepdims=True)
    var = jnp.mean(jnp.square(x - mean), axis=-1, keepdims=True)
    return (x - mean) * lax.rsqrt(var + eps) * gamma + beta


def _causal_mask(L):
    rows = lax.broadcasted_iota(jnp.int32, (L, L), 0)
    cols = lax.broadcasted_iota(jnp.int32, (L, L), 1)
    return rows >= cols           # position i may attend to positions j <= i


def _block_math(x, tmask3, allowed,
                ln1g, ln1b, wq, bq, wkv, bkv, wo, bo,
                ln2g, ln2b, w1, b1, w2, b2,
                *, num_heads, in_kernel):
    """One SASRec transformer block (matches COTA.log2feats loop body)."""
    TB, L, H = x.shape
    nh = num_heads
    dh = H // nh
    scale = 1.0 / math.sqrt(dh)

    # attention layernorm; SASRec uses Q = LN(seqs), K = V = seqs
    q_in = _layernorm(x, ln1g, ln1b)

    def proj(inp, w, b):
        # bf16 inputs, f32 accumulation (MXU fast path)
        flat = inp.reshape(TB * L, inp.shape[-1]).astype(w.dtype)
        out = jnp.dot(flat, w, preferred_element_type=jnp.float32)
        return (out + b[None, :]).reshape(TB, L, -1)

    q = proj(q_in, wq, bq) * scale          # fold 1/sqrt(dh) into Q (small tensor)
    kv = proj(x, wkv, bkv)                  # fused K|V projection: (H -> 2H)
    k, v = kv[:, :, :H], kv[:, :, H:]

    # fold the heads into the batch dim of a single contraction: (nh*TB, L, dh)
    def split_heads(t):
        return jnp.concatenate(
            [t[:, :, h * dh:(h + 1) * dh] for h in range(nh)], axis=0)

    qh = split_heads(q).astype(jnp.bfloat16)
    kh = split_heads(k).astype(jnp.bfloat16)
    vh = split_heads(v).astype(jnp.bfloat16)

    s = jnp.einsum("bqd,bkd->bqk", qh, kh,
                   preferred_element_type=jnp.float32)        # (nh*TB, L, L) f32
    s = jnp.where(allowed[None, :, :], s, -1e30)
    s = s - jnp.max(s, axis=-1, keepdims=True)
    p = jnp.exp(s)
    denom = jnp.sum(p, axis=-1, keepdims=True)
    if in_kernel:
        p = p * pl.reciprocal(denom, approx=True)             # EUP slot, frees VALU
    else:
        p = p / denom

    oh = jnp.einsum("bqk,bkd->bqd", p.astype(jnp.bfloat16), vh,
                    preferred_element_type=jnp.float32)        # (nh*TB, L, dh)
    attn = jnp.concatenate(
        [oh[h * TB:(h + 1) * TB] for h in range(nh)], axis=-1)  # (TB, L, H)

    mha = proj(attn, wo, bo)
    seqs = q_in + mha                        # residual off the layernormed Q

    # forward layernorm + point-wise feed-forward (Conv1d k=1 == matmul)
    y = _layernorm(seqs, ln2g, ln2b)
    h1 = jnp.maximum(proj(y, w1, b1), 0.0)
    h2 = proj(h1, w2, b2)
    ffn = h2 + y                             # PointWiseFeedForward residual

    return ffn * tmask3                      # timeline (padding) mask


# ----------------------------- Pallas kernel ------------------------------- #

def _cota_kernel(num_blocks, num_heads,
                 seqs_ref, tmask_ref, pos_ref, neg_ref,
                 ln1g_ref, ln1b_ref, wq_ref, bq_ref, wkv_ref, bkv_ref,
                 wo_ref, bo_ref, ln2g_ref, ln2b_ref,
                 w1_ref, b1_ref, w2_ref, b2_ref,
                 lastg_ref, lastb_ref,
                 feats_ref, plog_ref, nlog_ref):
    x = seqs_ref[...]            # (TB, L, H) f32 activation tile
    tmask3 = tmask_ref[...]      # (TB, L, 1) f32 timeline mask
    L = x.shape[1]
    allowed = _causal_mask(L)    # hoisted: built once per kernel invocation

    prm_refs = (ln1g_ref, ln1b_ref, wq_ref, bq_ref, wkv_ref, bkv_ref,
                wo_ref, bo_ref, ln2g_ref, ln2b_ref,
                w1_ref, b1_ref, w2_ref, b2_ref)
    # activations stay in VMEM across all blocks (no HBM round trips)
    for blk in range(num_blocks):
        x = _block_math(x, tmask3, allowed,
                        *[r[blk] for r in prm_refs],
                        num_heads=num_heads, in_kernel=True)

    feats = _layernorm(x, lastg_ref[0], lastb_ref[0])
    feats_ref[...] = feats
    plog_ref[...] = jnp.sum(feats * pos_ref[...], axis=-1, keepdims=True)
    nlog_ref[...] = jnp.sum(feats * neg_ref[...], axis=-1, keepdims=True)


def _resident_spec(arr):
    """Full-array block with a constant index_map -> stays VMEM-resident."""
    nd = arr.ndim

    def idx(b):
        return (0,) * nd

    return pl.BlockSpec(arr.shape, idx)


# ----------------------------- model wrapper ------------------------------- #

def init_params(key, item_num, hidden_units, maxlen, num_blocks):
    H = hidden_units

    def nk():
        nonlocal key
        key, sub = jax.random.split(key)
        return sub

    item_emb = jax.random.normal(nk(), (item_num + 1, H), jnp.float32) * 0.1
    item_emb = item_emb.at[0].set(0.0)          # padding_idx = 0
    pos_emb = jax.random.normal(nk(), (maxlen, H), jnp.float32) * 0.1

    per_block = []
    for _ in range(num_blocks):
        in_proj_w = jax.random.normal(nk(), (3 * H, H), jnp.float32) * 0.05
        in_proj_b = jax.random.normal(nk(), (3 * H,), jnp.float32) * 0.01
        # torch computes x @ W.T; pre-transpose so the kernel does x @ W.
        wq_t = in_proj_w[:H].T
        wkv_t = jnp.concatenate(
            [in_proj_w[H:2 * H].T, in_proj_w[2 * H:].T], axis=1)   # (H, 2H)
        bq, bkv = in_proj_b[:H], in_proj_b[H:]
        wo = jax.random.normal(nk(), (H, H), jnp.float32) * 0.05
        bo = jax.random.normal(nk(), (H,), jnp.float32) * 0.01
        w1 = jax.random.normal(nk(), (H, H), jnp.float32) * 0.05   # conv1 (out,in)
        b1 = jax.random.normal(nk(), (H,), jnp.float32) * 0.01
        w2 = jax.random.normal(nk(), (H, H), jnp.float32) * 0.05   # conv2 (out,in)
        b2 = jax.random.normal(nk(), (H,), jnp.float32) * 0.01
        per_block.append((
            jnp.ones((H,), jnp.float32), jnp.zeros((H,), jnp.float32),   # ln1
            wq_t.astype(jnp.bfloat16), bq,
            wkv_t.astype(jnp.bfloat16), bkv,
            wo.T.astype(jnp.bfloat16), bo,
            jnp.ones((H,), jnp.float32), jnp.zeros((H,), jnp.float32),   # ln2
            w1.T.astype(jnp.bfloat16), b1,
            w2.T.astype(jnp.bfloat16), b2))

    # stack every field along a leading "block" axis (order matches the kernel)
    stacked = tuple(jnp.stack(f, axis=0) for f in zip(*per_block))
    last_ln = (jnp.ones((1, H), jnp.float32), jnp.zeros((1, H), jnp.float32))
    return {"item_emb": item_emb, "pos_emb": pos_emb,
            "stacked": stacked, "last_ln": last_ln}


def cota_forward(params, user_ids, log_seqs, pos_seqs, neg_seqs,
                 *, num_heads, use_pallas=True, batch_tile=1):
    """Mirrors COTA.forward: returns (log_feats, pos_logits, neg_logits)."""
    del user_ids  # unused by the reference forward as well
    item_emb, pos_emb = params["item_emb"], params["pos_emb"]
    stacked = params["stacked"]
    lastg, lastb = params["last_ln"]
    B, L = log_seqs.shape
    H = item_emb.shape[1]
    num_blocks = stacked[0].shape[0]
    assert H % num_heads == 0, "num_heads must divide hidden_units"

    # ---- embedding glue (plain JAX) ----
    seqs = jnp.take(item_emb, log_seqs, axis=0) * (H ** 0.5)
    seqs = seqs + pos_emb[None, :L, :]
    tmask3 = (log_seqs != 0).astype(jnp.float32)[:, :, None]   # (B, L, 1)
    seqs = seqs * tmask3
    pos_embs = jnp.take(item_emb, pos_seqs, axis=0)
    neg_embs = jnp.take(item_emb, neg_seqs, axis=0)

    if not use_pallas:   # pure-JAX reference (same math, no Pallas)
        allowed = _causal_mask(L)
        x = seqs
        for blk in range(num_blocks):
            x = _block_math(x, tmask3, allowed,
                            *[a[blk] for a in stacked],
                            num_heads=num_heads, in_kernel=False)
        feats = _layernorm(x, lastg[0], lastb[0])
        return (feats,
                jnp.sum(feats * pos_embs, axis=-1),
                jnp.sum(feats * neg_embs, axis=-1))

    # ---- fused encoder kernel (grid over batch tiles) ----
    tb = max(1, min(batch_tile, B))
    while B % tb:                 # largest tile <= batch_tile that divides B
        tb -= 1
    grid = (B // tb,)

    act_spec = pl.BlockSpec((tb, L, H), lambda b: (b, 0, 0))
    msk_spec = pl.BlockSpec((tb, L, 1), lambda b: (b, 0, 0))

    in_specs = ([act_spec, msk_spec, act_spec, act_spec]
                + [_resident_spec(a) for a in stacked]
                + [_resident_spec(lastg), _resident_spec(lastb)])
    out_specs = (act_spec, msk_spec, msk_spec)
    out_shape = (jax.ShapeDtypeStruct((B, L, H), jnp.float32),
                 jax.ShapeDtypeStruct((B, L, 1), jnp.float32),
                 jax.ShapeDtypeStruct((B, L, 1), jnp.float32))

    feats, plog3, nlog3 = pl.pallas_call(
        functools.partial(_cota_kernel, num_blocks, num_heads),
        out_shape=out_shape,
        grid=grid,
        in_specs=in_specs,
        out_specs=out_specs,
        compiler_params=pltpu.CompilerParams(
            dimension_semantics=("parallel",),          # both TCs on v7x
            vmem_limit_bytes=64 * 1024 * 1024),         # explicit, not defaults
    )(seqs, tmask3, pos_embs, neg_embs, *stacked, lastg, lastb)
    return feats, plog3[:, :, 0], nlog3[:, :, 0]


# --------------------------------- main ------------------------------------ #

if __name__ == "__main__":
    B, L, H = 2, 8, 32
    num_blocks, num_heads = 2, 2
    item_num = 50

    key = jax.random.PRNGKey(0)
    key, pkey, k1, k2, k3 = jax.random.split(key, 5)
    params = init_params(pkey, item_num, H, L, num_blocks)

    log_seqs = jax.random.randint(k1, (B, L), 0, item_num + 1, dtype=jnp.int32)
    log_seqs = log_seqs.at[0, :2].set(0)   # exercise the padding / timeline mask
    pos_seqs = jax.random.randint(k2, (B, L), 1, item_num + 1, dtype=jnp.int32)
    neg_seqs = jax.random.randint(k3, (B, L), 1, item_num + 1, dtype=jnp.int32)
    user_ids = jnp.arange(B, dtype=jnp.int32)

    log_feats, pos_logits, neg_logits = cota_forward(
        params, user_ids, log_seqs, pos_seqs, neg_seqs, num_heads=num_heads)
    jax.block_until_ready((log_feats, pos_logits, neg_logits))

    # pure-JAX reference (same bf16/f32 math, no Pallas) for correctness check
    ref_feats, ref_plog, ref_nlog = cota_forward(
        params, user_ids, log_seqs, pos_seqs, neg_seqs,
        num_heads=num_heads, use_pallas=False)

    assert jnp.allclose(log_feats, ref_feats, atol=2e-2, rtol=2e-2)
    assert jnp.allclose(pos_logits, ref_plog, atol=2e-2, rtol=2e-2)
    assert jnp.allclose(neg_logits, ref_nlog, atol=2e-2, rtol=2e-2)

    print("KERNEL_OK")
</pallas_src>

<mosaic_0001>
module attributes {stable_mosaic.version = 11 : i64} {
  func.func @_cota_kernel(%arg0: i32, %arg1: memref<1x8x32xf32, #tpu.memory_space<vmem>>, %arg2: memref<1x8x1xf32, #tpu.memory_space<vmem>>, %arg3: memref<1x8x32xf32, #tpu.memory_space<vmem>>, %arg4: memref<1x8x32xf32, #tpu.memory_space<vmem>>, %arg5: memref<2x32xf32, #tpu.memory_space<vmem>>, %arg6: memref<2x32xf32, #tpu.memory_space<vmem>>, %arg7: memref<2x32x32xbf16, #tpu.memory_space<vmem>>, %arg8: memref<2x32xf32, #tpu.memory_space<vmem>>, %arg9: memref<2x32x64xbf16, #tpu.memory_space<vmem>>, %arg10: memref<2x64xf32, #tpu.memory_space<vmem>>, %arg11: memref<2x32x32xbf16, #tpu.memory_space<vmem>>, %arg12: memref<2x32xf32, #tpu.memory_space<vmem>>, %arg13: memref<2x32xf32, #tpu.memory_space<vmem>>, %arg14: memref<2x32xf32, #tpu.memory_space<vmem>>, %arg15: memref<2x32x32xbf16, #tpu.memory_space<vmem>>, %arg16: memref<2x32xf32, #tpu.memory_space<vmem>>, %arg17: memref<2x32x32xbf16, #tpu.memory_space<vmem>>, %arg18: memref<2x32xf32, #tpu.memory_space<vmem>>, %arg19: memref<1x32xf32, #tpu.memory_space<vmem>>, %arg20: memref<1x32xf32, #tpu.memory_space<vmem>>, %arg21: memref<1x8x32xf32, #tpu.memory_space<vmem>>, %arg22: memref<1x8x1xf32, #tpu.memory_space<vmem>>, %arg23: memref<1x8x1xf32, #tpu.memory_space<vmem>>) attributes {dimension_semantics = [#tpu.dimension_semantics<parallel>], iteration_bounds = array<i64: 2>, scalar_prefetch = 0 : i64, scratch_operands = 0 : i64, tpu.core_type = #tpu.core_type<tc>, window_params = [{transform_indices = @transform_0, window_bounds = array<i64: 1, 8, 32>}, {transform_indices = @transform_1, window_bounds = array<i64: 1, 8, 1>}, {transform_indices = @transform_2, window_bounds = array<i64: 1, 8, 32>}, {transform_indices = @transform_3, window_bounds = array<i64: 1, 8, 32>}, {pipeline_mode = #tpu.pipeline_mode<synchronous>, transform_indices = @transform_4, window_bounds = array<i64: 2, 32>}, {pipeline_mode = #tpu.pipeline_mode<synchronous>, transform_indices = @transform_5, window_bounds = array<i64: 2, 32>}, {pipeline_mode = #tpu.pipeline_mode<synchronous>, transform_indices = @transform_6, window_bounds = array<i64: 2, 32, 32>}, {pipeline_mode = #tpu.pipeline_mode<synchronous>, transform_indices = @transform_7, window_bounds = array<i64: 2, 32>}, {pipeline_mode = #tpu.pipeline_mode<synchronous>, transform_indices = @transform_8, window_bounds = array<i64: 2, 32, 64>}, {pipeline_mode = #tpu.pipeline_mode<synchronous>, transform_indices = @transform_9, window_bounds = array<i64: 2, 64>}, {pipeline_mode = #tpu.pipeline_mode<synchronous>, transform_indices = @transform_10, window_bounds = array<i64: 2, 32, 32>}, {pipeline_mode = #tpu.pipeline_mode<synchronous>, transform_indices = @transform_11, window_bounds = array<i64: 2, 32>}, {pipeline_mode = #tpu.pipeline_mode<synchronous>, transform_indices = @transform_12, window_bounds = array<i64: 2, 32>}, {pipeline_mode = #tpu.pipeline_mode<synchronous>, transform_indices = @transform_13, window_bounds = array<i64: 2, 32>}, {pipeline_mode = #tpu.pipeline_mode<synchronous>, transform_indices = @transform_14, window_bounds = array<i64: 2, 32, 32>}, {pipeline_mode = #tpu.pipeline_mode<synchronous>, transform_indices = @transform_15, window_bounds = array<i64: 2, 32>}, {pipeline_mode = #tpu.pipeline_mode<synchronous>, transform_indices = @transform_16, window_bounds = array<i64: 2, 32, 32>}, {pipeline_mode = #tpu.pipeline_mode<synchronous>, transform_indices = @transform_17, window_bounds = array<i64: 2, 32>}, {pipeline_mode = #tpu.pipeline_mode<synchronous>, transform_indices = @transform_18, window_bounds = array<i64: 1, 32>}, {pipeline_mode = #tpu.pipeline_mode<synchronous>, transform_indices = @transform_19, window_bounds = array<i64: 1, 32>}, {transform_indices = @transform_20, window_bounds = array<i64: 1, 8, 32>}, {transform_indices = @transform_21, window_bounds = array<i64: 1, 8, 1>}, {transform_indices = @transform_22, window_bounds = array<i64: 1, 8, 1>}]} {
    %c0 = arith.constant 0 : index
    %c0_0 = arith.constant 0 : index
    %c0_1 = arith.constant 0 : index
    %0 = vector.load %arg1[%c0, %c0_0, %c0_1] : memref<1x8x32xf32, #tpu.memory_space<vmem>>, vector<1x8x32xf32>
    %c0_2 = arith.constant 0 : index
    %c0_3 = arith.constant 0 : index
    %c0_4 = arith.constant 0 : index
    %1 = vector.load %arg2[%c0_2, %c0_3, %c0_4] : memref<1x8x1xf32, #tpu.memory_space<vmem>>, vector<1x8x1xf32>
    %2 = tpu.iota {dimensions = array<i32: 0>} : vector<8x8xi32>
    %3 = tpu.iota {dimensions = array<i32: 1>} : vector<8x8xi32>
    %4 = arith.cmpi sge, %2, %3 : vector<8x8xi32>
    %c0_5 = arith.constant 0 : index
    %c0_6 = arith.constant 0 : index
    %5 = vector.load %arg5[%c0_5, %c0_6] : memref<2x32xf32, #tpu.memory_space<vmem>>, vector<1x32xf32>
    %6 = vector.shape_cast %5 : vector<1x32xf32> to vector<32xf32>
    %c0_7 = arith.constant 0 : index
    %c0_8 = arith.constant 0 : index
    %7 = vector.load %arg6[%c0_7, %c0_8] : memref<2x32xf32, #tpu.memory_space<vmem>>, vector<1x32xf32>
    %8 = vector.shape_cast %7 : vector<1x32xf32> to vector<32xf32>
    %c0_9 = arith.constant 0 : index
    %c0_10 = arith.constant 0 : index
    %c0_11 = arith.constant 0 : index
    %9 = vector.load %arg7[%c0_9, %c0_10, %c0_11] : memref<2x32x32xbf16, #tpu.memory_space<vmem>>, vector<1x32x32xbf16>
    %10 = vector.shape_cast %9 : vector<1x32x32xbf16> to vector<32x32xbf16>
    %c0_12 = arith.constant 0 : index
    %c0_13 = arith.constant 0 : index
    %11 = vector.load %arg8[%c0_12, %c0_13] : memref<2x32xf32, #tpu.memory_space<vmem>>, vector<1x32xf32>
    %12 = vector.shape_cast %11 : vector<1x32xf32> to vector<32xf32>
    %c0_14 = arith.constant 0 : index
    %c0_15 = arith.constant 0 : index
    %c0_16 = arith.constant 0 : index
    %13 = vector.load %arg9[%c0_14, %c0_15, %c0_16] : memref<2x32x64xbf16, #tpu.memory_space<vmem>>, vector<1x32x64xbf16>
    %14 = vector.shape_cast %13 : vector<1x32x64xbf16> to vector<32x64xbf16>
    %c0_17 = arith.constant 0 : index
    %c0_18 = arith.constant 0 : index
    %15 = vector.load %arg10[%c0_17, %c0_18] : memref<2x64xf32, #tpu.memory_space<vmem>>, vector<1x64xf32>
    %16 = vector.shape_cast %15 : vector<1x64xf32> to vector<64xf32>
    %c0_19 = arith.constant 0 : index
    %c0_20 = arith.constant 0 : index
    %c0_21 = arith.constant 0 : index
    %17 = vector.load %arg11[%c0_19, %c0_20, %c0_21] : memref<2x32x32xbf16, #tpu.memory_space<vmem>>, vector<1x32x32xbf16>
    %18 = vector.shape_cast %17 : vector<1x32x32xbf16> to vector<32x32xbf16>
    %c0_22 = arith.constant 0 : index
    %c0_23 = arith.constant 0 : index
    %19 = vector.load %arg12[%c0_22, %c0_23] : memref<2x32xf32, #tpu.memory_space<vmem>>, vector<1x32xf32>
    %20 = vector.shape_cast %19 : vector<1x32xf32> to vector<32xf32>
    %c0_24 = arith.constant 0 : index
    %c0_25 = arith.constant 0 : index
    %21 = vector.load %arg13[%c0_24, %c0_25] : memref<2x32xf32, #tpu.memory_space<vmem>>, vector<1x32xf32>
    %22 = vector.shape_cast %21 : vector<1x32xf32> to vector<32xf32>
    %c0_26 = arith.constant 0 : index
    %c0_27 = arith.constant 0 : index
    %23 = vector.load %arg14[%c0_26, %c0_27] : memref<2x32xf32, #tpu.memory_space<vmem>>, vector<1x32xf32>
    %24 = vector.shape_cast %23 : vector<1x32xf32> to vector<32xf32>
    %c0_28 = arith.constant 0 : index
    %c0_29 = arith.constant 0 : index
    %c0_30 = arith.constant 0 : index
    %25 = vector.load %arg15[%c0_28, %c0_29, %c0_30] : memref<2x32x32xbf16, #tpu.memory_space<vmem>>, vector<1x32x32xbf16>
    %26 = vector.shape_cast %25 : vector<1x32x32xbf16> to vector<32x32xbf16>
    %c0_31 = arith.constant 0 : index
    %c0_32 = arith.constant 0 : index
    %27 = vector.load %arg16[%c0_31, %c0_32] : memref<2x32xf32, #tpu.memory_space<vmem>>, vector<1x32xf32>
    %28 = vector.shape_cast %27 : vector<1x32xf32> to vector<32xf32>
    %c0_33 = arith.constant 0 : index
    %c0_34 = arith.constant 0 : index
    %c0_35 = arith.constant 0 : index
    %29 = vector.load %arg17[%c0_33, %c0_34, %c0_35] : memref<2x32x32xbf16, #tpu.memory_space<vmem>>, vector<1x32x32xbf16>
    %30 = vector.shape_cast %29 : vector<1x32x32xbf16> to vector<32x32xbf16>
    %c0_36 = arith.constant 0 : index
    %c0_37 = arith.constant 0 : index
    %31 = vector.load %arg18[%c0_36, %c0_37] : memref<2x32xf32, #tpu.memory_space<vmem>>, vector<1x32xf32>
    %32 = vector.shape_cast %31 : vector<1x32xf32> to vector<32xf32>
    %cst = arith.constant dense<0.000000e+00> : vector<1x8xf32>
    %33 = vector.multi_reduction <add>, %0, %cst [2] : vector<1x8x32xf32> to vector<1x8xf32>
    %34 = vector.shape_cast %33 : vector<1x8xf32> to vector<1x8x1xf32>
    %cst_38 = arith.constant 3.200000e+01 : f32
    %35 = vector.broadcast %cst_38 : f32 to vector<1x8x1xf32>
    %36 = arith.divf %34, %35 : vector<1x8x1xf32>
    %37 = vector.broadcast %36 : vector<1x8x1xf32> to vector<1x8x32xf32>
    %38 = arith.subf %0, %37 : vector<1x8x32xf32>
    %39 = arith.mulf %38, %38 : vector<1x8x32xf32>
    %cst_39 = arith.constant dense<0.000000e+00> : vector<1x8xf32>
    %40 = vector.multi_reduction <add>, %39, %cst_39 [2] : vector<1x8x32xf32> to vector<1x8xf32>
    %41 = vector.shape_cast %40 : vector<1x8xf32> to vector<1x8x1xf32>
    %cst_40 = arith.constant 3.200000e+01 : f32
    %42 = vector.broadcast %cst_40 : f32 to vector<1x8x1xf32>
    %43 = arith.divf %41, %42 : vector<1x8x1xf32>
    %44 = vector.broadcast %36 : vector<1x8x1xf32> to vector<1x8x32xf32>
    %45 = arith.subf %0, %44 : vector<1x8x32xf32>
    %cst_41 = arith.constant 9.99999993E-9 : f32
    %46 = vector.broadcast %cst_41 : f32 to vector<1x8x1xf32>
    %47 = arith.addf %43, %46 : vector<1x8x1xf32>
    %48 = math.rsqrt %47 : vector<1x8x1xf32>
    %49 = vector.broadcast %48 : vector<1x8x1xf32> to vector<1x8x32xf32>
    %50 = arith.mulf %45, %49 : vector<1x8x32xf32>
    %51 = vector.shape_cast %6 : vector<32xf32> to vector<1x1x32xf32>
    %52 = vector.broadcast %51 : vector<1x1x32xf32> to vector<1x8x32xf32>
    %53 = arith.mulf %50, %52 : vector<1x8x32xf32>
    %54 = vector.shape_cast %8 : vector<32xf32> to vector<1x1x32xf32>
    %55 = vector.broadcast %54 : vector<1x1x32xf32> to vector<1x8x32xf32>
    %56 = arith.addf %53, %55 : vector<1x8x32xf32>
    %57 = vector.shape_cast %56 : vector<1x8x32xf32> to vector<8x32xf32>
    %58 = arith.truncf %57 : vector<8x32xf32> to vector<8x32xbf16>
    %cst_42 = arith.constant dense<0.000000e+00> : vector<8x32xf32>
    %59 = tpu.matmul %58, %10, %cst_42 {dimension_numbers = #tpu.dot_dimension_numbers<[1], [0], [0], [1], [0, 0, 1, 1], [], []>} : vector<8x32xbf16>, vector<32x32xbf16>, vector<8x32xf32> -> vector<8x32xf32>
    %60 = vector.shape_cast %12 : vector<32xf32> to vector<1x32xf32>
    %61 = vector.broadcast %60 : vector<1x32xf32> to vector<8x32xf32>
    %62 = arith.addf %59, %61 : vector<8x32xf32>
    %63 = vector.shape_cast %62 : vector<8x32xf32> to vector<1x8x32xf32>
    %cst_43 = arith.constant 2.500000e-01 : f32
    %64 = vector.broadcast %cst_43 : f32 to vector<1x8x32xf32>
    %65 = arith.mulf %63, %64 : vector<1x8x32xf32>
    %66 = vector.shape_cast %0 : vector<1x8x32xf32> to vector<8x32xf32>
    %67 = arith.truncf %66 : vector<8x32xf32> to vector<8x32xbf16>
    %cst_44 = arith.constant dense<0.000000e+00> : vector<8x64xf32>
    %68 = tpu.matmul %67, %14, %cst_44 {dimension_numbers = #tpu.dot_dimension_numbers<[1], [0], [0], [1], [0, 0, 1, 1], [], []>} : vector<8x32xbf16>, vector<32x64xbf16>, vector<8x64xf32> -> vector<8x64xf32>
    %69 = vector.shape_cast %16 : vector<64xf32> to vector<1x64xf32>
    %70 = vector.broadcast %69 : vector<1x64xf32> to vector<8x64xf32>
    %71 = arith.addf %68, %70 : vector<8x64xf32>
    %72 = vector.shape_cast %71 : vector<8x64xf32> to vector<1x8x64xf32>
    %73 = vector.extract_strided_slice %72 {offsets = [0, 0, 0], sizes = [1, 8, 32], strides = [1, 1, 1]} : vector<1x8x64xf32> to vector<1x8x32xf32>
    %74 = vector.extract_strided_slice %72 {offsets = [0, 0, 32], sizes = [1, 8, 32], strides = [1, 1, 1]} : vector<1x8x64xf32> to vector<1x8x32xf32>
    %75 = vector.extract_strided_slice %65 {offsets = [0, 0, 0], sizes = [1, 8, 16], strides = [1, 1, 1]} : vector<1x8x32xf32> to vector<1x8x16xf32>
    %76 = vector.extract_strided_slice %65 {offsets = [0, 0, 16], sizes = [1, 8, 16], strides = [1, 1, 1]} : vector<1x8x32xf32> to vector<1x8x16xf32>
    %77 = tpu.concatenate %75, %76 in 0 : vector<1x8x16xf32>, vector<1x8x16xf32> -> vector<2x8x16xf32>
    %78 = arith.truncf %77 : vector<2x8x16xf32> to vector<2x8x16xbf16>
    %79 = vector.extract_strided_slice %73 {offsets = [0, 0, 0], sizes = [1, 8, 16], strides = [1, 1, 1]} : vector<1x8x32xf32> to vector<1x8x16xf32>
    %80 = vector.extract_strided_slice %73 {offsets = [0, 0, 16], sizes = [1, 8, 16], strides = [1, 1, 1]} : vector<1x8x32xf32> to vector<1x8x16xf32>
    %81 = tpu.concatenate %79, %80 in 0 : vector<1x8x16xf32>, vector<1x8x16xf32> -> vector<2x8x16xf32>
    %82 = arith.truncf %81 : vector<2x8x16xf32> to vector<2x8x16xbf16>
    %83 = vector.extract_strided_slice %74 {offsets = [0, 0, 0], sizes = [1, 8, 16], strides = [1, 1, 1]} : vector<1x8x32xf32> to vector<1x8x16xf32>
    %84 = vector.extract_strided_slice %74 {offsets = [0, 0, 16], sizes = [1, 8, 16], strides = [1, 1, 1]} : vector<1x8x32xf32> to vector<1x8x16xf32>
    %85 = tpu.concatenate %83, %84 in 0 : vector<1x8x16xf32>, vector<1x8x16xf32> -> vector<2x8x16xf32>
    %86 = arith.truncf %85 : vector<2x8x16xf32> to vector<2x8x16xbf16>
    "tpu.trace_start"() <{level = 10 : i32, message = "bqd,bkd->bqk"}> : () -> ()
    %cst_45 = arith.constant dense<0.000000e+00> : vector<2x8x8xf32>
    %87 = tpu.matmul %78, %82, %cst_45 {dimension_numbers = #tpu.dot_dimension_numbers<[2], [2], [1], [1], [0, 0, 0, 1, 1, 1], [0], [0]>} : vector<2x8x16xbf16>, vector<2x8x16xbf16>, vector<2x8x8xf32> -> vector<2x8x8xf32>
    "tpu.trace_stop"() : () -> ()
    %88 = vector.shape_cast %4 : vector<8x8xi1> to vector<1x8x8xi1>
    %cst_46 = arith.constant -1.000000e+30 : f32
    %89 = vector.shape_cast %88 : vector<1x8x8xi1> to vector<1x8x8xi1>
    %90 = vector.broadcast %89 : vector<1x8x8xi1> to vector<2x8x8xi1>
    %91 = vector.broadcast %cst_46 : f32 to vector<2x8x8xf32>
    %92 = arith.select %90, %87, %91 : vector<2x8x8xi1>, vector<2x8x8xf32>
    %cst_47 = arith.constant dense<0xFF800000> : vector<2x8xf32>
    %93 = vector.multi_reduction <maximumf>, %92, %cst_47 [2] : vector<2x8x8xf32> to vector<2x8xf32>
    %94 = vector.shape_cast %93 : vector<2x8xf32> to vector<2x8x1xf32>
    %95 = vector.broadcast %94 : vector<2x8x1xf32> to vector<2x8x8xf32>
    %96 = arith.subf %92, %95 : vector<2x8x8xf32>
    %97 = math.exp %96 : vector<2x8x8xf32>
    %cst_48 = arith.constant dense<0.000000e+00> : vector<2x8xf32>
    %98 = vector.multi_reduction <add>, %97, %cst_48 [2] : vector<2x8x8xf32> to vector<2x8xf32>
    %99 = vector.shape_cast %98 : vector<2x8xf32> to vector<2x8x1xf32>
    %100 = tpu.reciprocal %99 {approx = true} : vector<2x8x1xf32> -> vector<2x8x1xf32>
    %101 = vector.broadcast %100 : vector<2x8x1xf32> to vector<2x8x8xf32>
    %102 = arith.mulf %97, %101 : vector<2x8x8xf32>
    %103 = arith.truncf %102 : vector<2x8x8xf32> to vector<2x8x8xbf16>
    "tpu.trace_start"() <{level = 10 : i32, message = "bqk,bkd->bqd"}> : () -> ()
    %cst_49 = arith.constant dense<0.000000e+00> : vector<2x8x16xf32>
    %104 = tpu.matmul %103, %86, %cst_49 {dimension_numbers = #tpu.dot_dimension_numbers<[2], [1], [1], [2], [0, 0, 0, 1, 1, 2], [0], [0]>} : vector<2x8x8xbf16>, vector<2x8x16xbf16>, vector<2x8x16xf32> -> vector<2x8x16xf32>
    "tpu.trace_stop"() : () -> ()
    %105 = vector.extract_strided_slice %104 {offsets = [0, 0, 0], sizes = [1, 8, 16], strides = [1, 1, 1]} : vector<2x8x16xf32> to vector<1x8x16xf32>
    %106 = vector.extract_strided_slice %104 {offsets = [1, 0, 0], sizes = [1, 8, 16], strides = [1, 1, 1]} : vector<2x8x16xf32> to vector<1x8x16xf32>
    %107 = tpu.concatenate %105, %106 in 2 : vector<1x8x16xf32>, vector<1x8x16xf32> -> vector<1x8x32xf32>
    %108 = vector.shape_cast %107 : vector<1x8x32xf32> to vector<8x32xf32>
    %109 = arith.truncf %108 : vector<8x32xf32> to vector<8x32xbf16>
    %cst_50 = arith.constant dense<0.000000e+00> : vector<8x32xf32>
    %110 = tpu.matmul %109, %18, %cst_50 {dimension_numbers = #tpu.dot_dimension_numbers<[1], [0], [0], [1], [0, 0, 1, 1], [], []>} : vector<8x32xbf16>, vector<32x32xbf16>, vector<8x32xf32> -> vector<8x32xf32>
    %111 = vector.shape_cast %20 : vector<32xf32> to vector<1x32xf32>
    %112 = vector.broadcast %111 : vector<1x32xf32> to vector<8x32xf32>
    %113 = arith.addf %110, %112 : vector<8x32xf32>
    %114 = vector.shape_cast %113 : vector<8x32xf32> to vector<1x8x32xf32>
    %115 = arith.addf %56, %114 : vector<1x8x32xf32>
    %cst_51 = arith.constant dense<0.000000e+00> : vector<1x8xf32>
    %116 = vector.multi_reduction <add>, %115, %cst_51 [2] : vector<1x8x32xf32> to vector<1x8xf32>
    %117 = vector.shape_cast %116 : vector<1x8xf32> to vector<1x8x1xf32>
    %cst_52 = arith.constant 3.200000e+01 : f32
    %118 = vector.broadcast %cst_52 : f32 to vector<1x8x1xf32>
    %119 = arith.divf %117, %118 : vector<1x8x1xf32>
    %120 = vector.broadcast %119 : vector<1x8x1xf32> to vector<1x8x32xf32>
    %121 = arith.subf %115, %120 : vector<1x8x32xf32>
    %122 = arith.mulf %121, %121 : vector<1x8x32xf32>
    %cst_53 = arith.constant dense<0.000000e+00> : vector<1x8xf32>
    %123 = vector.multi_reduction <add>, %122, %cst_53 [2] : vector<1x8x32xf32> to vector<1x8xf32>
    %124 = vector.shape_cast %123 : vector<1x8xf32> to vector<1x8x1xf32>
    %cst_54 = arith.constant 3.200000e+01 : f32
    %125 = vector.broadcast %cst_54 : f32 to vector<1x8x1xf32>
    %126 = arith.divf %124, %125 : vector<1x8x1xf32>
    %127 = vector.broadcast %119 : vector<1x8x1xf32> to vector<1x8x32xf32>
    %128 = arith.subf %115, %127 : vector<1x8x32xf32>
    %cst_55 = arith.constant 9.99999993E-9 : f32
    %129 = vector.broadcast %cst_55 : f32 to vector<1x8x1xf32>
    %130 = arith.addf %126, %129 : vector<1x8x1xf32>
    %131 = math.rsqrt %130 : vector<1x8x1xf32>
    %132 = vector.broadcast %131 : vector<1x8x1xf32> to vector<1x8x32xf32>
    %133 = arith.mulf %128, %132 : vector<1x8x32xf32>
    %134 = vector.shape_cast %22 : vector<32xf32> to vector<1x1x32xf32>
    %135 = vector.broadcast %134 : vector<1x1x32xf32> to vector<1x8x32xf32>
    %136 = arith.mulf %133, %135 : vector<1x8x32xf32>
    %137 = vector.shape_cast %24 : vector<32xf32> to vector<1x1x32xf32>
    %138 = vector.broadcast %137 : vector<1x1x32xf32> to vector<1x8x32xf32>
    %139 = arith.addf %136, %138 : vector<1x8x32xf32>
    %140 = vector.shape_cast %139 : vector<1x8x32xf32> to vector<8x32xf32>
    %141 = arith.truncf %140 : vector<8x32xf32> to vector<8x32xbf16>
    %cst_56 = arith.constant dense<0.000000e+00> : vector<8x32xf32>
    %142 = tpu.matmul %141, %26, %cst_56 {dimension_numbers = #tpu.dot_dimension_numbers<[1], [0], [0], [1], [0, 0, 1, 1], [], []>} : vector<8x32xbf16>, vector<32x32xbf16>, vector<8x32xf32> -> vector<8x32xf32>
    %143 = vector.shape_cast %28 : vector<32xf32> to vector<1x32xf32>
    %144 = vector.broadcast %143 : vector<1x32xf32> to vector<8x32xf32>
    %145 = arith.addf %142, %144 : vector<8x32xf32>
    %146 = vector.shape_cast %145 : vector<8x32xf32> to vector<1x8x32xf32>
    %cst_57 = arith.constant 0.000000e+00 : f32
    %147 = vector.broadcast %cst_57 : f32 to vector<1x8x32xf32>
    %148 = arith.maximumf %146, %147 : vector<1x8x32xf32>
    %149 = vector.shape_cast %148 : vector<1x8x32xf32> to vector<8x32xf32>
    %150 = arith.truncf %149 : vector<8x32xf32> to vector<8x32xbf16>
    %cst_58 = arith.constant dense<0.000000e+00> : vector<8x32xf32>
    %151 = tpu.matmul %150, %30, %cst_58 {dimension_numbers = #tpu.dot_dimension_numbers<[1], [0], [0], [1], [0, 0, 1, 1], [], []>} : vector<8x32xbf16>, vector<32x32xbf16>, vector<8x32xf32> -> vector<8x32xf32>
    %152 = vector.shape_cast %32 : vector<32xf32> to vector<1x32xf32>
    %153 = vector.broadcast %152 : vector<1x32xf32> to vector<8x32xf32>
    %154 = arith.addf %151, %153 : vector<8x32xf32>
    %155 = vector.shape_cast %154 : vector<8x32xf32> to vector<1x8x32xf32>
    %156 = arith.addf %155, %139 : vector<1x8x32xf32>
    %157 = vector.broadcast %1 : vector<1x8x1xf32> to vector<1x8x32xf32>
    %158 = arith.mulf %156, %157 : vector<1x8x32xf32>
    %c1 = arith.constant 1 : index
    %c0_59 = arith.constant 0 : index
    %159 = vector.load %arg5[%c1, %c0_59] : memref<2x32xf32, #tpu.memory_space<vmem>>, vector<1x32xf32>
    %160 = vector.shape_cast %159 : vector<1x32xf32> to vector<32xf32>
    %c1_60 = arith.constant 1 : index
    %c0_61 = arith.constant 0 : index
    %161 = vector.load %arg6[%c1_60, %c0_61] : memref<2x32xf32, #tpu.memory_space<vmem>>, vector<1x32xf32>
    %162 = vector.shape_cast %161 : vector<1x32xf32> to vector<32xf32>
    %c1_62 = arith.constant 1 : index
    %c0_63 = arith.constant 0 : index
    %c0_64 = arith.constant 0 : index
    %163 = vector.load %arg7[%c1_62, %c0_63, %c0_64] : memref<2x32x32xbf16, #tpu.memory_space<vmem>>, vector<1x32x32xbf16>
    %164 = vector.shape_cast %163 : vector<1x32x32xbf16> to vector<32x32xbf16>
    %c1_65 = arith.constant 1 : index
    %c0_66 = arith.constant 0 : index
    %165 = vector.load %arg8[%c1_65, %c0_66] : memref<2x32xf32, #tpu.memory_space<vmem>>, vector<1x32xf32>
    %166 = vector.shape_cast %165 : vector<1x32xf32> to vector<32xf32>
    %c1_67 = arith.constant 1 : index
    %c0_68 = arith.constant 0 : index
    %c0_69 = arith.constant 0 : index
    %167 = vector.load %arg9[%c1_67, %c0_68, %c0_69] : memref<2x32x64xbf16, #tpu.memory_space<vmem>>, vector<1x32x64xbf16>
    %168 = vector.shape_cast %167 : vector<1x32x64xbf16> to vector<32x64xbf16>
    %c1_70 = arith.constant 1 : index
    %c0_71 = arith.constant 0 : index
    %169 = vector.load %arg10[%c1_70, %c0_71] : memref<2x64xf32, #tpu.memory_space<vmem>>, vector<1x64xf32>
    %170 = vector.shape_cast %169 : vector<1x64xf32> to vector<64xf32>
    %c1_72 = arith.constant 1 : index
    %c0_73 = arith.constant 0 : index
    %c0_74 = arith.constant 0 : index
    %171 = vector.load %arg11[%c1_72, %c0_73, %c0_74] : memref<2x32x32xbf16, #tpu.memory_space<vmem>>, vector<1x32x32xbf16>
    %172 = vector.shape_cast %171 : vector<1x32x32xbf16> to vector<32x32xbf16>
    %c1_75 = arith.constant 1 : index
    %c0_76 = arith.constant 0 : index
    %173 = vector.load %arg12[%c1_75, %c0_76] : memref<2x32xf32, #tpu.memory_space<vmem>>, vector<1x32xf32>
    %174 = vector.shape_cast %173 : vector<1x32xf32> to vector<32xf32>
    %c1_77 = arith.constant 1 : index
    %c0_78 = arith.constant 0 : index
    %175 = vector.load %arg13[%c1_77, %c0_78] : memref<2x32xf32, #tpu.memory_space<vmem>>, vector<1x32xf32>
    %176 = vector.shape_cast %175 : vector<1x32xf32> to vector<32xf32>
    %c1_79 = arith.constant 1 : index
    %c0_80 = arith.constant 0 : index
    %177 = vector.load %arg14[%c1_79, %c0_80] : memref<2x32xf32, #tpu.memory_space<vmem>>, vector<1x32xf32>
    %178 = vector.shape_cast %177 : vector<1x32xf32> to vector<32xf32>
    %c1_81 = arith.constant 1 : index
    %c0_82 = arith.constant 0 : index
    %c0_83 = arith.constant 0 : index
    %179 = vector.load %arg15[%c1_81, %c0_82, %c0_83] : memref<2x32x32xbf16, #tpu.memory_space<vmem>>, vector<1x32x32xbf16>
    %180 = vector.shape_cast %179 : vector<1x32x32xbf16> to vector<32x32xbf16>
    %c1_84 = arith.constant 1 : index
    %c0_85 = arith.constant 0 : index
    %181 = vector.load %arg16[%c1_84, %c0_85] : memref<2x32xf32, #tpu.memory_space<vmem>>, vector<1x32xf32>
    %182 = vector.shape_cast %181 : vector<1x32xf32> to vector<32xf32>
    %c1_86 = arith.constant 1 : index
    %c0_87 = arith.constant 0 : index
    %c0_88 = arith.constant 0 : index
    %183 = vector.load %arg17[%c1_86, %c0_87, %c0_88] : memref<2x32x32xbf16, #tpu.memory_space<vmem>>, vector<1x32x32xbf16>
    %184 = vector.shape_cast %183 : vector<1x32x32xbf16> to vector<32x32xbf16>
    %c1_89 = arith.constant 1 : index
    %c0_90 = arith.constant 0 : index
    %185 = vector.load %arg18[%c1_89, %c0_90] : memref<2x32xf32, #tpu.memory_space<vmem>>, vector<1x32xf32>
    %186 = vector.shape_cast %185 : vector<1x32xf32> to vector<32xf32>
    %cst_91 = arith.constant dense<0.000000e+00> : vector<1x8xf32>
    %187 = vector.multi_reduction <add>, %158, %cst_91 [2] : vector<1x8x32xf32> to vector<1x8xf32>
    %188 = vector.shape_cast %187 : vector<1x8xf32> to vector<1x8x1xf32>
    %cst_92 = arith.constant 3.200000e+01 : f32
    %189 = vector.broadcast %cst_92 : f32 to vector<1x8x1xf32>
    %190 = arith.divf %188, %189 : vector<1x8x1xf32>
    %191 = vector.broadcast %190 : vector<1x8x1xf32> to vector<1x8x32xf32>
    %192 = arith.subf %158, %191 : vector<1x8x32xf32>
    %193 = arith.mulf %192, %192 : vector<1x8x32xf32>
    %cst_93 = arith.constant dense<0.000000e+00> : vector<1x8xf32>
    %194 = vector.multi_reduction <add>, %193, %cst_93 [2] : vector<1x8x32xf32> to vector<1x8xf32>
    %195 = vector.shape_cast %194 : vector<1x8xf32> to vector<1x8x1xf32>
    %cst_94 = arith.constant 3.200000e+01 : f32
    %196 = vector.broadcast %cst_94 : f32 to vector<1x8x1xf32>
    %197 = arith.divf %195, %196 : vector<1x8x1xf32>
    %198 = vector.broadcast %190 : vector<1x8x1xf32> to vector<1x8x32xf32>
    %199 = arith.subf %158, %198 : vector<1x8x32xf32>
    %cst_95 = arith.constant 9.99999993E-9 : f32
    %200 = vector.broadcast %cst_95 : f32 to vector<1x8x1xf32>
    %201 = arith.addf %197, %200 : vector<1x8x1xf32>
    %202 = math.rsqrt %201 : vector<1x8x1xf32>
    %203 = vector.broadcast %202 : vector<1x8x1xf32> to vector<1x8x32xf32>
    %204 = arith.mulf %199, %203 : vector<1x8x32xf32>
    %205 = vector.shape_cast %160 : vector<32xf32> to vector<1x1x32xf32>
    %206 = vector.broadcast %205 : vector<1x1x32xf32> to vector<1x8x32xf32>
    %207 = arith.mulf %204, %206 : vector<1x8x32xf32>
    %208 = vector.shape_cast %162 : vector<32xf32> to vector<1x1x32xf32>
    %209 = vector.broadcast %208 : vector<1x1x32xf32> to vector<1x8x32xf32>
    %210 = arith.addf %207, %209 : vector<1x8x32xf32>
    %211 = vector.shape_cast %210 : vector<1x8x32xf32> to vector<8x32xf32>
    %212 = arith.truncf %211 : vector<8x32xf32> to vector<8x32xbf16>
    %cst_96 = arith.constant dense<0.000000e+00> : vector<8x32xf32>
    %213 = tpu.matmul %212, %164, %cst_96 {dimension_numbers = #tpu.dot_dimension_numbers<[1], [0], [0], [1], [0, 0, 1, 1], [], []>} : vector<8x32xbf16>, vector<32x32xbf16>, vector<8x32xf32> -> vector<8x32xf32>
    %214 = vector.shape_cast %166 : vector<32xf32> to vector<1x32xf32>
    %215 = vector.broadcast %214 : vector<1x32xf32> to vector<8x32xf32>
    %216 = arith.addf %213, %215 : vector<8x32xf32>
    %217 = vector.shape_cast %216 : vector<8x32xf32> to vector<1x8x32xf32>
    %cst_97 = arith.constant 2.500000e-01 : f32
    %218 = vector.broadcast %cst_97 : f32 to vector<1x8x32xf32>
    %219 = arith.mulf %217, %218 : vector<1x8x32xf32>
    %220 = vector.shape_cast %158 : vector<1x8x32xf32> to vector<8x32xf32>
    %221 = arith.truncf %220 : vector<8x32xf32> to vector<8x32xbf16>
    %cst_98 = arith.constant dense<0.000000e+00> : vector<8x64xf32>
    %222 = tpu.matmul %221, %168, %cst_98 {dimension_numbers = #tpu.dot_dimension_numbers<[1], [0], [0], [1], [0, 0, 1, 1], [], []>} : vector<8x32xbf16>, vector<32x64xbf16>, vector<8x64xf32> -> vector<8x64xf32>
    %223 = vector.shape_cast %170 : vector<64xf32> to vector<1x64xf32>
    %224 = vector.broadcast %223 : vector<1x64xf32> to vector<8x64xf32>
    %225 = arith.addf %222, %224 : vector<8x64xf32>
    %226 = vector.shape_cast %225 : vector<8x64xf32> to vector<1x8x64xf32>
    %227 = vector.extract_strided_slice %226 {offsets = [0, 0, 0], sizes = [1, 8, 32], strides = [1, 1, 1]} : vector<1x8x64xf32> to vector<1x8x32xf32>
    %228 = vector.extract_strided_slice %226 {offsets = [0, 0, 32], sizes = [1, 8, 32], strides = [1, 1, 1]} : vector<1x8x64xf32> to vector<1x8x32xf32>
    %229 = vector.extract_strided_slice %219 {offsets = [0, 0, 0], sizes = [1, 8, 16], strides = [1, 1, 1]} : vector<1x8x32xf32> to vector<1x8x16xf32>
    %230 = vector.extract_strided_slice %219 {offsets = [0, 0, 16], sizes = [1, 8, 16], strides = [1, 1, 1]} : vector<1x8x32xf32> to vector<1x8x16xf32>
    %231 = tpu.concatenate %229, %230 in 0 : vector<1x8x16xf32>, vector<1x8x16xf32> -> vector<2x8x16xf32>
    %232 = arith.truncf %231 : vector<2x8x16xf32> to vector<2x8x16xbf16>
    %233 = vector.extract_strided_slice %227 {offsets = [0, 0, 0], sizes = [1, 8, 16], strides = [1, 1, 1]} : vector<1x8x32xf32> to vector<1x8x16xf32>
    %234 = vector.extract_strided_slice %227 {offsets = [0, 0, 16], sizes = [1, 8, 16], strides = [1, 1, 1]} : vector<1x8x32xf32> to vector<1x8x16xf32>
    %235 = tpu.concatenate %233, %234 in 0 : vector<1x8x16xf32>, vector<1x8x16xf32> -> vector<2x8x16xf32>
    %236 = arith.truncf %235 : vector<2x8x16xf32> to vector<2x8x16xbf16>
    %237 = vector.extract_strided_slice %228 {offsets = [0, 0, 0], sizes = [1, 8, 16], strides = [1, 1, 1]} : vector<1x8x32xf32> to vector<1x8x16xf32>
    %238 = vector.extract_strided_slice %228 {offsets = [0, 0, 16], sizes = [1, 8, 16], strides = [1, 1, 1]} : vector<1x8x32xf32> to vector<1x8x16xf32>
    %239 = tpu.concatenate %237, %238 in 0 : vector<1x8x16xf32>, vector<1x8x16xf32> -> vector<2x8x16xf32>
    %240 = arith.truncf %239 : vector<2x8x16xf32> to vector<2x8x16xbf16>
    "tpu.trace_start"() <{level = 10 : i32, message = "bqd,bkd->bqk"}> : () -> ()
    %cst_99 = arith.constant dense<0.000000e+00> : vector<2x8x8xf32>
    %241 = tpu.matmul %232, %236, %cst_99 {dimension_numbers = #tpu.dot_dimension_numbers<[2], [2], [1], [1], [0, 0, 0, 1, 1, 1], [0], [0]>} : vector<2x8x16xbf16>, vector<2x8x16xbf16>, vector<2x8x8xf32> -> vector<2x8x8xf32>
    "tpu.trace_stop"() : () -> ()
    %242 = vector.shape_cast %4 : vector<8x8xi1> to vector<1x8x8xi1>
    %cst_100 = arith.constant -1.000000e+30 : f32
    %243 = vector.shape_cast %242 : vector<1x8x8xi1> to vector<1x8x8xi1>
    %244 = vector.broadcast %243 : vector<1x8x8xi1> to vector<2x8x8xi1>
    %245 = vector.broadcast %cst_100 : f32 to vector<2x8x8xf32>
    %246 = arith.select %244, %241, %245 : vector<2x8x8xi1>, vector<2x8x8xf32>
    %cst_101 = arith.constant dense<0xFF800000> : vector<2x8xf32>
    %247 = vector.multi_reduction <maximumf>, %246, %cst_101 [2] : vector<2x8x8xf32> to vector<2x8xf32>
    %248 = vector.shape_cast %247 : vector<2x8xf32> to vector<2x8x1xf32>
    %249 = vector.broadcast %248 : vector<2x8x1xf32> to vector<2x8x8xf32>
    %250 = arith.subf %246, %249 : vector<2x8x8xf32>
    %251 = math.exp %250 : vector<2x8x8xf32>
    %cst_102 = arith.constant dense<0.000000e+00> : vector<2x8xf32>
    %252 = vector.multi_reduction <add>, %251, %cst_102 [2] : vector<2x8x8xf32> to vector<2x8xf32>
    %253 = vector.shape_cast %252 : vector<2x8xf32> to vector<2x8x1xf32>
    %254 = tpu.reciprocal %253 {approx = true} : vector<2x8x1xf32> -> vector<2x8x1xf32>
    %255 = vector.broadcast %254 : vector<2x8x1xf32> to vector<2x8x8xf32>
    %256 = arith.mulf %251, %255 : vector<2x8x8xf32>
    %257 = arith.truncf %256 : vector<2x8x8xf32> to vector<2x8x8xbf16>
    "tpu.trace_start"() <{level = 10 : i32, message = "bqk,bkd->bqd"}> : () -> ()
    %cst_103 = arith.constant dense<0.000000e+00> : vector<2x8x16xf32>
    %258 = tpu.matmul %257, %240, %cst_103 {dimension_numbers = #tpu.dot_dimension_numbers<[2], [1], [1], [2], [0, 0, 0, 1, 1, 2], [0], [0]>} : vector<2x8x8xbf16>, vector<2x8x16xbf16>, vector<2x8x16xf32> -> vector<2x8x16xf32>
    "tpu.trace_stop"() : () -> ()
    %259 = vector.extract_strided_slice %258 {offsets = [0, 0, 0], sizes = [1, 8, 16], strides = [1, 1, 1]} : vector<2x8x16xf32> to vector<1x8x16xf32>
    %260 = vector.extract_strided_slice %258 {offsets = [1, 0, 0], sizes = [1, 8, 16], strides = [1, 1, 1]} : vector<2x8x16xf32> to vector<1x8x16xf32>
    %261 = tpu.concatenate %259, %260 in 2 : vector<1x8x16xf32>, vector<1x8x16xf32> -> vector<1x8x32xf32>
    %262 = vector.shape_cast %261 : vector<1x8x32xf32> to vector<8x32xf32>
    %263 = arith.truncf %262 : vector<8x32xf32> to vector<8x32xbf16>
    %cst_104 = arith.constant dense<0.000000e+00> : vector<8x32xf32>
    %264 = tpu.matmul %263, %172, %cst_104 {dimension_numbers = #tpu.dot_dimension_numbers<[1], [0], [0], [1], [0, 0, 1, 1], [], []>} : vector<8x32xbf16>, vector<32x32xbf16>, vector<8x32xf32> -> vector<8x32xf32>
    %265 = vector.shape_cast %174 : vector<32xf32> to vector<1x32xf32>
    %266 = vector.broadcast %265 : vector<1x32xf32> to vector<8x32xf32>
    %267 = arith.addf %264, %266 : vector<8x32xf32>
    %268 = vector.shape_cast %267 : vector<8x32xf32> to vector<1x8x32xf32>
    %269 = arith.addf %210, %268 : vector<1x8x32xf32>
    %cst_105 = arith.constant dense<0.000000e+00> : vector<1x8xf32>
    %270 = vector.multi_reduction <add>, %269, %cst_105 [2] : vector<1x8x32xf32> to vector<1x8xf32>
    %271 = vector.shape_cast %270 : vector<1x8xf32> to vector<1x8x1xf32>
    %cst_106 = arith.constant 3.200000e+01 : f32
    %272 = vector.broadcast %cst_106 : f32 to vector<1x8x1xf32>
    %273 = arith.divf %271, %272 : vector<1x8x1xf32>
    %274 = vector.broadcast %273 : vector<1x8x1xf32> to vector<1x8x32xf32>
    %275 = arith.subf %269, %274 : vector<1x8x32xf32>
    %276 = arith.mulf %275, %275 : vector<1x8x32xf32>
    %cst_107 = arith.constant dense<0.000000e+00> : vector<1x8xf32>
    %277 = vector.multi_reduction <add>, %276, %cst_107 [2] : vector<1x8x32xf32> to vector<1x8xf32>
    %278 = vector.shape_cast %277 : vector<1x8xf32> to vector<1x8x1xf32>
    %cst_108 = arith.constant 3.200000e+01 : f32
    %279 = vector.broadcast %cst_108 : f32 to vector<1x8x1xf32>
    %280 = arith.divf %278, %279 : vector<1x8x1xf32>
    %281 = vector.broadcast %273 : vector<1x8x1xf32> to vector<1x8x32xf32>
    %282 = arith.subf %269, %281 : vector<1x8x32xf32>
    %cst_109 = arith.constant 9.99999993E-9 : f32
    %283 = vector.broadcast %cst_109 : f32 to vector<1x8x1xf32>
    %284 = arith.addf %280, %283 : vector<1x8x1xf32>
    %285 = math.rsqrt %284 : vector<1x8x1xf32>
    %286 = vector.broadcast %285 : vector<1x8x1xf32> to vector<1x8x32xf32>
    %287 = arith.mulf %282, %286 : vector<1x8x32xf32>
    %288 = vector.shape_cast %176 : vector<32xf32> to vector<1x1x32xf32>
    %289 = vector.broadcast %288 : vector<1x1x32xf32> to vector<1x8x32xf32>
    %290 = arith.mulf %287, %289 : vector<1x8x32xf32>
    %291 = vector.shape_cast %178 : vector<32xf32> to vector<1x1x32xf32>
    %292 = vector.broadcast %291 : vector<1x1x32xf32> to vector<1x8x32xf32>
    %293 = arith.addf %290, %292 : vector<1x8x32xf32>
    %294 = vector.shape_cast %293 : vector<1x8x32xf32> to vector<8x32xf32>
    %295 = arith.truncf %294 : vector<8x32xf32> to vector<8x32xbf16>
    %cst_110 = arith.constant dense<0.000000e+00> : vector<8x32xf32>
    %296 = tpu.matmul %295, %180, %cst_110 {dimension_numbers = #tpu.dot_dimension_numbers<[1], [0], [0], [1], [0, 0, 1, 1], [], []>} : vector<8x32xbf16>, vector<32x32xbf16>, vector<8x32xf32> -> vector<8x32xf32>
    %297 = vector.shape_cast %182 : vector<32xf32> to vector<1x32xf32>
    %298 = vector.broadcast %297 : vector<1x32xf32> to vector<8x32xf32>
    %299 = arith.addf %296, %298 : vector<8x32xf32>
    %300 = vector.shape_cast %299 : vector<8x32xf32> to vector<1x8x32xf32>
    %cst_111 = arith.constant 0.000000e+00 : f32
    %301 = vector.broadcast %cst_111 : f32 to vector<1x8x32xf32>
    %302 = arith.maximumf %300, %301 : vector<1x8x32xf32>
    %303 = vector.shape_cast %302 : vector<1x8x32xf32> to vector<8x32xf32>
    %304 = arith.truncf %303 : vector<8x32xf32> to vector<8x32xbf16>
    %cst_112 = arith.constant dense<0.000000e+00> : vector<8x32xf32>
    %305 = tpu.matmul %304, %184, %cst_112 {dimension_numbers = #tpu.dot_dimension_numbers<[1], [0], [0], [1], [0, 0, 1, 1], [], []>} : vector<8x32xbf16>, vector<32x32xbf16>, vector<8x32xf32> -> vector<8x32xf32>
    %306 = vector.shape_cast %186 : vector<32xf32> to vector<1x32xf32>
    %307 = vector.broadcast %306 : vector<1x32xf32> to vector<8x32xf32>
    %308 = arith.addf %305, %307 : vector<8x32xf32>
    %309 = vector.shape_cast %308 : vector<8x32xf32> to vector<1x8x32xf32>
    %310 = arith.addf %309, %293 : vector<1x8x32xf32>
    %311 = vector.broadcast %1 : vector<1x8x1xf32> to vector<1x8x32xf32>
    %312 = arith.mulf %310, %311 : vector<1x8x32xf32>
    %c0_113 = arith.constant 0 : index
    %c0_114 = arith.constant 0 : index
    %313 = vector.load %arg19[%c0_113, %c0_114] : memref<1x32xf32, #tpu.memory_space<vmem>>, vector<1x32xf32>
    %314 = vector.shape_cast %313 : vector<1x32xf32> to vector<32xf32>
    %c0_115 = arith.constant 0 : index
    %c0_116 = arith.constant 0 : index
    %315 = vector.load %arg20[%c0_115, %c0_116] : memref<1x32xf32, #tpu.memory_space<vmem>>, vector<1x32xf32>
    %316 = vector.shape_cast %315 : vector<1x32xf32> to vector<32xf32>
    %cst_117 = arith.constant dense<0.000000e+00> : vector<1x8xf32>
    %317 = vector.multi_reduction <add>, %312, %cst_117 [2] : vector<1x8x32xf32> to vector<1x8xf32>
    %318 = vector.shape_cast %317 : vector<1x8xf32> to vector<1x8x1xf32>
    %cst_118 = arith.constant 3.200000e+01 : f32
    %319 = vector.broadcast %cst_118 : f32 to vector<1x8x1xf32>
    %320 = arith.divf %318, %319 : vector<1x8x1xf32>
    %321 = vector.broadcast %320 : vector<1x8x1xf32> to vector<1x8x32xf32>
    %322 = arith.subf %312, %321 : vector<1x8x32xf32>
    %323 = arith.mulf %322, %322 : vector<1x8x32xf32>
    %cst_119 = arith.constant dense<0.000000e+00> : vector<1x8xf32>
    %324 = vector.multi_reduction <add>, %323, %cst_119 [2] : vector<1x8x32xf32> to vector<1x8xf32>
    %325 = vector.shape_cast %324 : vector<1x8xf32> to vector<1x8x1xf32>
    %cst_120 = arith.constant 3.200000e+01 : f32
    %326 = vector.broadcast %cst_120 : f32 to vector<1x8x1xf32>
    %327 = arith.divf %325, %326 : vector<1x8x1xf32>
    %328 = vector.broadcast %320 : vector<1x8x1xf32> to vector<1x8x32xf32>
    %329 = arith.subf %312, %328 : vector<1x8x32xf32>
    %cst_121 = arith.constant 9.99999993E-9 : f32
    %330 = vector.broadcast %cst_121 : f32 to vector<1x8x1xf32>
    %331 = arith.addf %327, %330 : vector<1x8x1xf32>
    %332 = math.rsqrt %331 : vector<1x8x1xf32>
    %333 = vector.broadcast %332 : vector<1x8x1xf32> to vector<1x8x32xf32>
    %334 = arith.mulf %329, %333 : vector<1x8x32xf32>
    %335 = vector.shape_cast %314 : vector<32xf32> to vector<1x1x32xf32>
    %336 = vector.broadcast %335 : vector<1x1x32xf32> to vector<1x8x32xf32>
    %337 = arith.mulf %334, %336 : vector<1x8x32xf32>
    %338 = vector.shape_cast %316 : vector<32xf32> to vector<1x1x32xf32>
    %339 = vector.broadcast %338 : vector<1x1x32xf32> to vector<1x8x32xf32>
    %340 = arith.addf %337, %339 : vector<1x8x32xf32>
    %c0_122 = arith.constant 0 : index
    %c0_123 = arith.constant 0 : index
    %c0_124 = arith.constant 0 : index
    %341 = vector.load %arg21[%c0_122, %c0_123, %c0_124] : memref<1x8x32xf32, #tpu.memory_space<vmem>>, vector<1x8x32xf32>
    tpu.vector_store %arg21[%c0_122, %c0_123, %c0_124], %340 {strides = array<i32>} : memref<1x8x32xf32, #tpu.memory_space<vmem>>, vector<1x8x32xf32>,
    %c0_125 = arith.constant 0 : index
    %c0_126 = arith.constant 0 : index
    %c0_127 = arith.constant 0 : index
    %342 = vector.load %arg3[%c0_125, %c0_126, %c0_127] : memref<1x8x32xf32, #tpu.memory_space<vmem>>, vector<1x8x32xf32>
    %343 = arith.mulf %340, %342 : vector<1x8x32xf32>
    %cst_128 = arith.constant dense<0.000000e+00> : vector<1x8xf32>
    %344 = vector.multi_reduction <add>, %343, %cst_128 [2] : vector<1x8x32xf32> to vector<1x8xf32>
    %345 = vector.shape_cast %344 : vector<1x8xf32> to vector<1x8x1xf32>
    %c0_129 = arith.constant 0 : index
    %c0_130 = arith.constant 0 : index
    %c0_131 = arith.constant 0 : index
    %346 = vector.load %arg22[%c0_129, %c0_130, %c0_131] : memref<1x8x1xf32, #tpu.memory_space<vmem>>, vector<1x8x1xf32>
    tpu.vector_store %arg22[%c0_129, %c0_130, %c0_131], %345 {strides = array<i32>} : memref<1x8x1xf32, #tpu.memory_space<vmem>>, vector<1x8x1xf32>,
    %c0_132 = arith.constant 0 : index
    %c0_133 = arith.constant 0 : index
    %c0_134 = arith.constant 0 : index
    %347 = vector.load %arg4[%c0_132, %c0_133, %c0_134] : memref<1x8x32xf32, #tpu.memory_space<vmem>>, vector<1x8x32xf32>
    %348 = arith.mulf %340, %347 : vector<1x8x32xf32>
    %cst_135 = arith.constant dense<0.000000e+00> : vector<1x8xf32>
    %349 = vector.multi_reduction <add>, %348, %cst_135 [2] : vector<1x8x32xf32> to vector<1x8xf32>
    %350 = vector.shape_cast %349 : vector<1x8xf32> to vector<1x8x1xf32>
    %c0_136 = arith.constant 0 : index
    %c0_137 = arith.constant 0 : index
    %c0_138 = arith.constant 0 : index
    %351 = vector.load %arg23[%c0_136, %c0_137, %c0_138] : memref<1x8x1xf32, #tpu.memory_space<vmem>>, vector<1x8x1xf32>
    tpu.vector_store %arg23[%c0_136, %c0_137, %c0_138], %350 {strides = array<i32>} : memref<1x8x1xf32, #tpu.memory_space<vmem>>, vector<1x8x1xf32>,
    return
  }
  func.func @transform_0(%arg0: i32) -> (i32, i32, i32) {
    %c0_i32 = arith.constant 0 : i32
    %c0_i32_0 = arith.constant 0 : i32
    %c0_i32_1 = arith.constant 0 : i32
    return %arg0, %c0_i32, %c0_i32_0 : i32, i32, i32
  }
  func.func @transform_1(%arg0: i32) -> (i32, i32, i32) {
    %c0_i32 = arith.constant 0 : i32
    %c0_i32_0 = arith.constant 0 : i32
    %c0_i32_1 = arith.constant 0 : i32
    return %arg0, %c0_i32, %c0_i32_0 : i32, i32, i32
  }
  func.func @transform_2(%arg0: i32) -> (i32, i32, i32) {
    %c0_i32 = arith.constant 0 : i32
    %c0_i32_0 = arith.constant 0 : i32
    %c0_i32_1 = arith.constant 0 : i32
    return %arg0, %c0_i32, %c0_i32_0 : i32, i32, i32
  }
  func.func @transform_3(%arg0: i32) -> (i32, i32, i32) {
    %c0_i32 = arith.constant 0 : i32
    %c0_i32_0 = arith.constant 0 : i32
    %c0_i32_1 = arith.constant 0 : i32
    return %arg0, %c0_i32, %c0_i32_0 : i32, i32, i32
  }
  func.func @transform_4(%arg0: i32) -> (i32, i32) {
    %c0_i32 = arith.constant 0 : i32
    %c0_i32_0 = arith.constant 0 : i32
    %c0_i32_1 = arith.constant 0 : i32
    return %c0_i32, %c0_i32_0 : i32, i32
  }
  func.func @transform_5(%arg0: i32) -> (i32, i32) {
    %c0_i32 = arith.constant 0 : i32
    %c0_i32_0 = arith.constant 0 : i32
    %c0_i32_1 = arith.constant 0 : i32
    return %c0_i32, %c0_i32_0 : i32, i32
  }
  func.func @transform_6(%arg0: i32) -> (i32, i32, i32) {
    %c0_i32 = arith.constant 0 : i32
    %c0_i32_0 = arith.constant 0 : i32
    %c0_i32_1 = arith.constant 0 : i32
    %c0_i32_2 = arith.constant 0 : i32
    return %c0_i32, %c0_i32_0, %c0_i32_1 : i32, i32, i32
  }
  func.func @transform_7(%arg0: i32) -> (i32, i32) {
    %c0_i32 = arith.constant 0 : i32
    %c0_i32_0 = arith.constant 0 : i32
    %c0_i32_1 = arith.constant 0 : i32
    return %c0_i32, %c0_i32_0 : i32, i32
  }
  func.func @transform_8(%arg0: i32) -> (i32, i32, i32) {
    %c0_i32 = arith.constant 0 : i32
    %c0_i32_0 = arith.constant 0 : i32
    %c0_i32_1 = arith.constant 0 : i32
    %c0_i32_2 = arith.constant 0 : i32
    return %c0_i32, %c0_i32_0, %c0_i32_1 : i32, i32, i32
  }
  func.func @transform_9(%arg0: i32) -> (i32, i32) {
    %c0_i32 = arith.constant 0 : i32
    %c0_i32_0 = arith.constant 0 : i32
    %c0_i32_1 = arith.constant 0 : i32
    return %c0_i32, %c0_i32_0 : i32, i32
  }
  func.func @transform_10(%arg0: i32) -> (i32, i32, i32) {
    %c0_i32 = arith.constant 0 : i32
    %c0_i32_0 = arith.constant 0 : i32
    %c0_i32_1 = arith.constant 0 : i32
    %c0_i32_2 = arith.constant 0 : i32
    return %c0_i32, %c0_i32_0, %c0_i32_1 : i32, i32, i32
  }
  func.func @transform_11(%arg0: i32) -> (i32, i32) {
    %c0_i32 = arith.constant 0 : i32
    %c0_i32_0 = arith.constant 0 : i32
    %c0_i32_1 = arith.constant 0 : i32
    return %c0_i32, %c0_i32_0 : i32, i32
  }
  func.func @transform_12(%arg0: i32) -> (i32, i32) {
    %c0_i32 = arith.constant 0 : i32
    %c0_i32_0 = arith.constant 0 : i32
    %c0_i32_1 = arith.constant 0 : i32
    return %c0_i32, %c0_i32_0 : i32, i32
  }
  func.func @transform_13(%arg0: i32) -> (i32, i32) {
    %c0_i32 = arith.constant 0 : i32
    %c0_i32_0 = arith.constant 0 : i32
    %c0_i32_1 = arith.constant 0 : i32
    return %c0_i32, %c0_i32_0 : i32, i32
  }
  func.func @transform_14(%arg0: i32) -> (i32, i32, i32) {
    %c0_i32 = arith.constant 0 : i32
    %c0_i32_0 = arith.constant 0 : i32
    %c0_i32_1 = arith.constant 0 : i32
    %c0_i32_2 = arith.constant 0 : i32
    return %c0_i32, %c0_i32_0, %c0_i32_1 : i32, i32, i32
  }
  func.func @transform_15(%arg0: i32) -> (i32, i32) {
    %c0_i32 = arith.constant 0 : i32
    %c0_i32_0 = arith.constant 0 : i32
    %c0_i32_1 = arith.constant 0 : i32
    return %c0_i32, %c0_i32_0 : i32, i32
  }
  func.func @transform_16(%arg0: i32) -> (i32, i32, i32) {
    %c0_i32 = arith.constant 0 : i32
    %c0_i32_0 = arith.constant 0 : i32
    %c0_i32_1 = arith.constant 0 : i32
    %c0_i32_2 = arith.constant 0 : i32
    return %c0_i32, %c0_i32_0, %c0_i32_1 : i32, i32, i32
  }
  func.func @transform_17(%arg0: i32) -> (i32, i32) {
    %c0_i32 = arith.constant 0 : i32
    %c0_i32_0 = arith.constant 0 : i32
    %c0_i32_1 = arith.constant 0 : i32
    return %c0_i32, %c0_i32_0 : i32, i32
  }
  func.func @transform_18(%arg0: i32) -> (i32, i32) {
    %c0_i32 = arith.constant 0 : i32
    %c0_i32_0 = arith.constant 0 : i32
    %c0_i32_1 = arith.constant 0 : i32
    return %c0_i32, %c0_i32_0 : i32, i32
  }
  func.func @transform_19(%arg0: i32) -> (i32, i32) {
    %c0_i32 = arith.constant 0 : i32
    %c0_i32_0 = arith.constant 0 : i32
    %c0_i32_1 = arith.constant 0 : i32
    return %c0_i32, %c0_i32_0 : i32, i32
  }
  func.func @transform_20(%arg0: i32) -> (i32, i32, i32) {
    %c0_i32 = arith.constant 0 : i32
    %c0_i32_0 = arith.constant 0 : i32
    %c0_i32_1 = arith.constant 0 : i32
    return %arg0, %c0_i32, %c0_i32_0 : i32, i32, i32
  }
  func.func @transform_21(%arg0: i32) -> (i32, i32, i32) {
    %c0_i32 = arith.constant 0 : i32
    %c0_i32_0 = arith.constant 0 : i32
    %c0_i32_1 = arith.constant 0 : i32
    return %arg0, %c0_i32, %c0_i32_0 : i32, i32, i32
  }
  func.func @transform_22(%arg0: i32) -> (i32, i32, i32) {
    %c0_i32 = arith.constant 0 : i32
    %c0_i32_0 = arith.constant 0 : i32
    %c0_i32_1 = arith.constant 0 : i32
    return %arg0, %c0_i32, %c0_i32_0 : i32, i32, i32
  }
}

</mosaic_0001>

<bundles_post_ra>
// kernel: tpu_custom_call.1
= control target key start
LH: loop header
LB: loop body
LE: loop exit
PB: predicated region body
PF: predicated region fallthrough
CT: control target
= control target key end

     0   :  { %s5098_s0 = inlined_call_operand.hbm [shape: f32[2,8,32], index: 0, kind: input, shape index: {}]   ;;  %s5099_s1 = inlined_call_operand.hbm [shape: f32[2,8,1], index: 1, kind: input, shape index: {}]   ;;  %s5100_s2 = inlined_call_operand.hbm [shape: f32[2,8,32], index: 2, kind: input, shape index: {}]   ;;  %s5101_s3 = inlined_call_operand.hbm [shape: f32[2,8,32], index: 3, kind: input, shape index: {}]   ;;  %s5102_s4 = inlined_call_operand.hbm [shape: f32[2,32], index: 4, kind: input, shape index: {}]   ;;  %s5103_s5 = inlined_call_operand.hbm [shape: f32[2,32], index: 5, kind: input, shape index: {}]   ;;  %s5104_s6 = inlined_call_operand.hbm [shape: bf16[2,32,32], index: 6, kind: input, shape index: {}]   ;;  %s5105_s7 = inlined_call_operand.hbm [shape: f32[2,32], index: 7, kind: input, shape index: {}]   ;;  %s5106_s8 = inlined_call_operand.hbm [shape: bf16[2,32,64], index: 8, kind: input, shape index: {}]   ;;  %s5107_s9 = inlined_call_operand.hbm [shape: f32[2,64], index: 9, kind: input, shape index: {}]   ;;  %s5108_s10 = inlined_call_operand.hbm [shape: bf16[2,32,32], index: 10, kind: input, shape index: {}]   ;;  %s5109_s11 = inlined_call_operand.hbm [shape: f32[2,32], index: 11, kind: input, shape index: {}]   ;;  %s5110_s12 = inlined_call_operand.hbm [shape: f32[2,32], index: 12, kind: input, shape index: {}]   ;;  %s5111_s13 = inlined_call_operand.hbm [shape: f32[2,32], index: 13, kind: input, shape index: {}]   ;;  %s5112_s14 = inlined_call_operand.hbm [shape: bf16[2,32,32], index: 14, kind: input, shape index: {}]   ;;  %s5113_s15 = inlined_call_operand.hbm [shape: f32[2,32], index: 15, kind: input, shape index: {}]   ;;  %s5114_s16 = inlined_call_operand.hbm [shape: bf16[2,32,32], index: 16, kind: input, shape index: {}]   ;;  %s5115_s17 = inlined_call_operand.hbm [shape: f32[2,32], index: 17, kind: input, shape index: {}]   ;;  %s5116_s18 = inlined_call_operand.hbm [shape: f32[1,32], index: 18, kind: input, shape index: {}]   ;;  %s5117_s19 = inlined_call_operand.hbm [shape: f32[1,32], index: 19, kind: input, shape index: {}]   ;;  %s5118_s20 = inlined_call_operand.hbm [shape: f32[2,8,32], index: 20, kind: output, shape index: {0}]   ;;  %s5119_s21 = inlined_call_operand.hbm [shape: f32[2,8,1], index: 21, kind: output, shape index: {1}]   ;;  %s5120_s22 = inlined_call_operand.hbm [shape: f32[2,8,1], index: 22, kind: output, shape index: {2}]  }
   0x1   :  { %5161 = sst [smem:[#allocation57_spill]] %s5098_s0 }
   0x2   :  { %5162 = sst [smem:[#allocation58_spill]] %s5099_s1 }
   0x3   :  { %5163 = sst [smem:[#allocation59_spill]] %s5100_s2 }
   0x4   :  { %5164 = sst [smem:[#allocation60_spill]] %s5101_s3 }
   0x5   :  { %5165 = sst [smem:[#allocation61_spill]] %s5102_s4 }
   0x6   :  { %5166 = sst [smem:[#allocation62_spill]] %s5103_s5 }
   0x7   :  { %5167 = sst [smem:[#allocation63_spill]] %s5104_s6 }
   0x8   :  { %5168 = sst [smem:[#allocation64_spill]] %s5105_s7 }
   0x9   :  { %5169 = sst [smem:[#allocation65_spill]] %s5106_s8 }
   0xa   :  { %5170 = sst [smem:[#allocation66_spill]] %s5107_s9 }
   0xb   :  { %5171 = sst [smem:[#allocation67_spill]] %s5108_s10 }
   0xc   :  { %5172 = sst [smem:[#allocation68_spill]] %s5109_s11 }
   0xd   :  { %5173 = sst [smem:[#allocation69_spill]] %s5110_s12 }
   0xe   :  { %5174 = sst [smem:[#allocation70_spill]] %s5111_s13 }
   0xf   :  { %5175 = sst [smem:[#allocation71_spill]] %s5112_s14 }
  0x10   :  { %5176 = sst [smem:[#allocation72_spill]] %s5113_s15 }
  0x11   :  { %5177 = sst [smem:[#allocation73_spill]] %s5114_s16 }
  0x12   :  { %5178 = sst [smem:[#allocation74_spill]] %s5115_s17 }
  0x13   :  { %5179 = sst [smem:[#allocation75_spill]] %s5116_s18 }
  0x14   :  { %5180 = sst [smem:[#allocation76_spill]] %s5117_s19 }
  0x15   :  { %5181 = sst [smem:[#allocation77_spill]] %s5118_s20 }
  0x16   :  { %5182 = sst [smem:[#allocation78_spill]] %s5119_s21 }
  0x17   :  { %5183 = sst [smem:[#allocation79_spill]] %s5120_s22 }
  0x18   :  { %28 = vsyncpa [#allocation3], 0 }
  0x19   :  { %30 = vsyncpa [#allocation3 + $0x1], 0 }
  0x1a   :  { %31 = vsyncpa [#allocation6], 0 }
  0x1b   :  { %33 = vsyncpa [#allocation6 + $0x1], 0 }
  0x1c   :  { %34 = vsyncpa [#allocation9], 0 }
  0x1d   :  { %36 = vsyncpa [#allocation9 + $0x1], 0 }
  0x1e   :  { %37 = vsyncpa [#allocation12], 0 }
  0x1f   :  { %38 = vsyncpa [#allocation15], 0 }
  0x20   :  { %39 = vsyncpa [#allocation18], 0 }
  0x21   :  { %40 = vsyncpa [#allocation21], 0 }
  0x22   :  { %41 = vsyncpa [#allocation24], 0 }
  0x23   :  { %42 = vsyncpa [#allocation27], 0 }
  0x24   :  { %43 = vsyncpa [#allocation30], 0 }
  0x25   :  { %44 = vsyncpa [#allocation33], 0 }
  0x26   :  { %45 = vsyncpa [#allocation4], 0 }
  0x27   :  { %47 = vsyncpa [#allocation4 + $0x1], 0 }
  0x28   :  { %48 = vsyncpa [#allocation36], 0 }
  0x29   :  { %50 = vsyncpa [#allocation36 + $0x1], 0  ;;  %s4192_s3 = smov 0   ;;  %s4194_s28 = smov 0  }
  0x2a   :  { %s4196_s29 = smov 0   ;;  %s4198_s30 = smov 0  }
  0x2b LB: > { %5184 = sst [smem:[#allocation52_spill]] %s4032_s3  ;;  %s4046_s4 = smov [#allocation10]   ;;  %s4044_s30 = sphi %s4198_s30, %s5257_s30   ;;  %s4040_s29 = sphi %s4196_s29, %s5261_s29   ;;  %s4036_s28 = sphi %s4194_s28, %s5260_s28   ;;  %s4032_s3 = sphi %s4192_s3, %s5259_s3  }
  0x2c   : > { %s592_s0 = sshll.u32 %s4046_s4, 4  ;;  %s4213_s23 = sadd.s32 4294967295, %s4044_s30   ;;  %s4218_s0 = int_to_ptr.vmem [resolvable:$true] %s592_s0 }
  0x2d   : > { %p2729_p0 = scmp.ge.s32.totalorder %s4044_s30, 1  ;;  %p5136_p1 = scmp.eq.s32.totalorder %s4213_s23, 0 }
  0x2e   : > { %p579_p2 = scmp.lt.s32.totalorder %s4044_s30, 3  ;;  %s4047_s5 = smov [#allocation11]  }
  0x2f   : > { %s603_s24 = sshll.u32 %s4047_s5, 4  ;;  %s4048_s6 = smov [#allocation14]   ;;  %s4227_s24 = int_to_ptr.vmem [resolvable:$true] %s603_s24 }
  0x30   : > { %p4220_p3 = pnand %p2729_p0, %p579_p2  ;;  %s627_s25 = sshll.u32 %s4048_s6, 4  ;;  %s4235_s25 = int_to_ptr.vmem [resolvable:$true] %s627_s25 }
  0x31   : > { %s4049_s2 = smov [#allocation17]   ;;  %s5188_s21 = sld [smem:[#allocation61_spill]] }
  0x32   : > { %s5185_s1 = scalar_select %p4220_p3, 1, 0 }
  0x33   : > { %p3097_p5 = pneg %p4220_p3  ;;  %s4237_s27 = sshll.u32 %s4049_s2, 4  ;;  %s652_s27 = int_to_ptr.vmem [resolvable:$true] %s4237_s27 }
  0x34   : > { %5186 = sst [smem:[#allocation53_spill]] %s5185_s1 }
  0x35   : > { %p4231_p6 = pnand %p3097_p5, %p5136_p1 }
  0x37   : > { %s5187_s26 = scalar_select %p4231_p6, 1, 0 }
  0x38   : > { %s3306_s20 = scalar_lea.hbm %s5188_s21, 32  ;;  %p4247_p8 = pneg %p4231_p6 }
  0x39   : > { %p3307_p7 = scmp.ne.s32.totalorder %s5188_s21, %s3306_s20  ;;  %p3313_p11 = scmp.lt.u32.totalorder %s3306_s20, %s5188_s21 }
  0x3a   : > { %s5189_s6 = scalar_select %p4247_p8, 1, 0 }
  0x3b   : > { %p3309_p9 = pnand %p4247_p8, %p3307_p7 }
  0x3d   : > { %p3310_p10 = pneg %p3309_p9 }
  0x3f   : > { %p3315_p12 = pnand %p3313_p11, %p3310_p10 }
  0x41   : > { %3318 = shalt.err (!%p3315_p12)
}
  0x42   : > { %s3319_s22 = scalar_lea.vmem %s4218_s0, 32  ;;  %p3327_p5 = scmp.lt.s32.totalorder %s4218_s0, %s4218_s0 }
  0x43   : > { %p3320_p13 = scmp.ne.s32.totalorder %s4218_s0, %s3319_s22  ;;  %p3328_p4 = scmp.lt.s32.totalorder %s3319_s22, %s3319_s22 }
  0x45   : > { %p3322_p0 = pnand %p3320_p13, %p4247_p8  ;;  %p3329_p7 = por %p3328_p4, %p3327_p5 }
  0x47   : > { %p3323_p2 = pneg %p3322_p0 }
  0x49   : > { %p3330_p9 = pnand %p3329_p7, %p3323_p2 }
  0x4b   : > { %3333 = shalt.err (!%p3330_p9)
}
  0x4c   : > { %3100 = dma.hbm_to_vmem [thread:$0]  (!%p4231_p6), %s5188_s21, 32, %s4218_s0, [#allocation9]  }
  0x4d   : > { %s5190_s5 = sld [smem:[#allocation62_spill]] }
  0x53   : > { %s3334_s2 = scalar_lea.hbm %s5190_s5, 32 }
  0x54   : > { %p3335_p10 = scmp.ne.s32.totalorder %s5190_s5, %s3334_s2  ;;  %p3341_p12 = scmp.lt.u32.totalorder %s3334_s2, %s5190_s5 }
  0x56   : > { %p3337_p4 = pnand %p3335_p10, %p4247_p8 }
  0x58   : > { %p3338_p11 = pneg %p3337_p4 }
  0x5a   : > { %p3343_p13 = pnand %p3341_p12, %p3338_p11 }
  0x5c   : > { %3346 = shalt.err (!%p3343_p13)
}
  0x5d   : > { %s3347_s0 = scalar_lea.vmem %s4227_s24, 32  ;;  %p3355_p7 = scmp.lt.s32.totalorder %s4227_s24, %s4227_s24 }
  0x5e   : > { %p3348_p0 = scmp.ne.s32.totalorder %s4227_s24, %s3347_s0  ;;  %p3356_p9 = scmp.lt.s32.totalorder %s3347_s0, %s3347_s0 }
  0x60   : > { %p3350_p2 = pnand %p3348_p0, %p4247_p8  ;;  %p3357_p10 = por %p3356_p9, %p3355_p7 }
  0x62   : > { %p3351_p5 = pneg %p3350_p2 }
  0x64   : > { %p3358_p4 = pnand %p3357_p10, %p3351_p5 }
  0x66   : > { %3361 = shalt.err (!%p3358_p4)
}
  0x67   : > { %3103 = dma.hbm_to_vmem [thread:$0]  (!%p4231_p6), %s5190_s5, 32, %s4227_s24, [#allocation12]  }
  0x68   : > { %s5191_s7 = sld [smem:[#allocation64_spill]] }
  0x6e   : > { %s3362_s20 = scalar_lea.hbm %s5191_s7, 32 }
  0x6f   : > { %p3363_p11 = scmp.ne.s32.totalorder %s5191_s7, %s3362_s20  ;;  %p3369_p0 = scmp.lt.u32.totalorder %s3362_s20, %s5191_s7 }
  0x71   : > { %p3365_p12 = pnand %p3363_p11, %p4247_p8 }
  0x73   : > { %p3366_p13 = pneg %p3365_p12 }
  0x75   : > { %p3371_p2 = pnand %p3369_p0, %p3366_p13 }
  0x77   : > { %3374 = shalt.err (!%p3371_p2)
}
  0x78   : > { %s3375_s24 = scalar_lea.vmem %s4235_s25, 32  ;;  %p3383_p10 = scmp.lt.s32.totalorder %s4235_s25, %s4235_s25 }
  0x79   : > { %p3376_p5 = scmp.ne.s32.totalorder %s4235_s25, %s3375_s24  ;;  %p3384_p4 = scmp.lt.s32.totalorder %s3375_s24, %s3375_s24 }
  0x7b   : > { %p3378_p7 = pnand %p3376_p5, %p4247_p8  ;;  %p3385_p11 = por %p3384_p4, %p3383_p10 }
  0x7d   : > { %p3379_p9 = pneg %p3378_p7 }
  0x7f   : > { %p3386_p12 = pnand %p3385_p11, %p3379_p9 }
  0x81   : > { %3389 = shalt.err (!%p3386_p12)
}
  0x82   : > { %3109 = dma.hbm_to_vmem [thread:$0]  (!%p4231_p6), %s5191_s7, 32, %s4235_s25, [#allocation15]  }
  0x83   : > { %s4050_s16 = smov [#allocation20]   ;;  %s5192_s9 = sld [smem:[#allocation66_spill]] }
  0x84   : > { %s675_s18 = sshll.u32 %s4050_s16, 4  ;;  %s676_s18 = int_to_ptr.vmem [resolvable:$true] %s675_s18 }
  0x89   : > { %s3390_s1 = scalar_lea.hbm %s5192_s9, 32 }
  0x8a   : > { %p3391_p13 = scmp.ne.s32.totalorder %s5192_s9, %s3390_s1  ;;  %p3397_p5 = scmp.lt.u32.totalorder %s3390_s1, %s5192_s9 }
  0x8c   : > { %p3393_p0 = pnand %p3391_p13, %p4247_p8 }
  0x8e   : > { %p3394_p2 = pneg %p3393_p0 }
  0x90   : > { %p3399_p7 = pnand %p3397_p5, %p3394_p2 }
  0x92   : > { %3402 = shalt.err (!%p3399_p7)
}
  0x93   : > { %s3403_s25 = scalar_lea.vmem %s652_s27, 32  ;;  %p3411_p11 = scmp.lt.s32.totalorder %s652_s27, %s652_s27 }
  0x94   : > { %p3404_p9 = scmp.ne.s32.totalorder %s652_s27, %s3403_s25  ;;  %p3412_p12 = scmp.lt.s32.totalorder %s3403_s25, %s3403_s25 }
  0x96   : > { %p3406_p10 = pnand %p3404_p9, %p4247_p8  ;;  %p3413_p1 = por %p3412_p12, %p3411_p11 }
  0x98   : > { %p3407_p4 = pneg %p3406_p10 }
  0x9a   : > { %p3414_p3 = pnand %p3413_p1, %p3407_p4 }
  0x9c   : > { %3417 = shalt.err (!%p3414_p3)
}
  0x9d   : > { %3115 = dma.hbm_to_vmem [thread:$0]  (!%p4231_p6), %s5192_s9, 32, %s652_s27, [#allocation18]  }
  0x9e   : > { %s5193_s11 = sld [smem:[#allocation68_spill]] }
  0xa4   : > { %s3418_s20 = scalar_lea.hbm %s5193_s11, 32 }
  0xa5   : > { %p3419_p13 = scmp.ne.s32.totalorder %s5193_s11, %s3418_s20  ;;  %p3425_p3 = scmp.lt.u32.totalorder %s3418_s20, %s5193_s11 }
  0xa7   : > { %p3421_p0 = pnand %p3419_p13, %p4247_p8 }
  0xa9   : > { %p3422_p1 = pneg %p3421_p0 }
  0xab   : > { %p3427_p2 = pnand %p3425_p3, %p3422_p1 }
  0xad   : > { %3430 = shalt.err (!%p3427_p2)
}
  0xae   : > { %s3431_s24 = scalar_lea.vmem %s676_s18, 32  ;;  %p3439_p10 = scmp.lt.s32.totalorder %s676_s18, %s676_s18 }
  0xaf   : > { %p3432_p5 = scmp.ne.s32.totalorder %s676_s18, %s3431_s24  ;;  %p3440_p4 = scmp.lt.s32.totalorder %s3431_s24, %s3431_s24 }
  0xb1   : > { %p3434_p7 = pnand %p3432_p5, %p4247_p8  ;;  %p3441_p11 = por %p3440_p4, %p3439_p10 }
  0xb3   : > { %p3435_p9 = pneg %p3434_p7 }
  0xb5   : > { %p3442_p12 = pnand %p3441_p11, %p3435_p9 }
  0xb7   : > { %3445 = shalt.err (!%p3442_p12)
}
  0xb8   : > { %3121 = dma.hbm_to_vmem [thread:$0]  (!%p4231_p6), %s5193_s11, 32, %s676_s18, [#allocation21]  }
  0xb9   : > { %s4051_s0 = smov [#allocation23]   ;;  %s4052_s16 = smov [#allocation26]  }
  0xba   : > { %s697_s14 = sshll.u32 %s4051_s0, 4  ;;  %s721_s19 = sshll.u32 %s4052_s16, 4  ;;  %s698_s14 = int_to_ptr.vmem [resolvable:$true] %s697_s14  ;;  %s722_s19 = int_to_ptr.vmem [resolvable:$true] %s721_s19 }
  0xbb   : > { %s5194_s13 = sld [smem:[#allocation70_spill]] }
  0xc1   : > { %s3446_s4 = scalar_lea.hbm %s5194_s13, 32 }
  0xc2   : > { %p3447_p13 = scmp.ne.s32.totalorder %s5194_s13, %s3446_s4  ;;  %p3453_p3 = scmp.lt.u32.totalorder %s3446_s4, %s5194_s13 }
  0xc4   : > { %p3449_p0 = pnand %p3447_p13, %p4247_p8 }
  0xc6   : > { %p3450_p1 = pneg %p3449_p0 }
  0xc8   : > { %p3455_p2 = pnand %p3453_p3, %p3450_p1 }
  0xca   : > { %3458 = shalt.err (!%p3455_p2)
}
  0xcb   : > { %s3459_s18 = scalar_lea.vmem %s698_s14, 32  ;;  %p3467_p10 = scmp.lt.s32.totalorder %s698_s14, %s698_s14 }
  0xcc   : > { %p3460_p5 = scmp.ne.s32.totalorder %s698_s14, %s3459_s18  ;;  %p3468_p4 = scmp.lt.s32.totalorder %s3459_s18, %s3459_s18 }
  0xce   : > { %p3462_p7 = pnand %p3460_p5, %p4247_p8  ;;  %p3469_p11 = por %p3468_p4, %p3467_p10 }
  0xd0   : > { %p3463_p9 = pneg %p3462_p7 }
  0xd2   : > { %p3470_p12 = pnand %p3469_p11, %p3463_p9 }
  0xd4   : > { %3473 = shalt.err (!%p3470_p12)
}
  0xd5   : > { %3127 = dma.hbm_to_vmem [thread:$0]  (!%p4231_p6), %s5194_s13, 32, %s698_s14, [#allocation24]  }
  0xd6   : > { %s5195_s15 = sld [smem:[#allocation72_spill]] }
  0xdc   : > { %s3474_s1 = scalar_lea.hbm %s5195_s15, 32 }
  0xdd   : > { %p3475_p13 = scmp.ne.s32.totalorder %s5195_s15, %s3474_s1  ;;  %p3481_p3 = scmp.lt.u32.totalorder %s3474_s1, %s5195_s15 }
  0xdf   : > { %p3477_p0 = pnand %p3475_p13, %p4247_p8 }
  0xe1   : > { %p3478_p1 = pneg %p3477_p0 }
  0xe3   : > { %p3483_p2 = pnand %p3481_p3, %p3478_p1 }
  0xe5   : > { %3486 = shalt.err (!%p3483_p2)
}
  0xe6   : > { %s3487_s27 = scalar_lea.vmem %s722_s19, 32  ;;  %p3495_p10 = scmp.lt.s32.totalorder %s722_s19, %s722_s19 }
  0xe7   : > { %p3488_p5 = scmp.ne.s32.totalorder %s722_s19, %s3487_s27  ;;  %p3496_p4 = scmp.lt.s32.totalorder %s3487_s27, %s3487_s27 }
  0xe9   : > { %p3490_p7 = pnand %p3488_p5, %p4247_p8  ;;  %p3497_p11 = por %p3496_p4, %p3495_p10 }
  0xeb   : > { %p3491_p9 = pneg %p3490_p7 }
  0xed   : > { %p3498_p12 = pnand %p3497_p11, %p3491_p9 }
  0xef   : > { %3501 = shalt.err (!%p3498_p12)
}
  0xf0   : > { %3133 = dma.hbm_to_vmem [thread:$0]  (!%p4231_p6), %s5195_s15, 32, %s722_s19, [#allocation27]  }
  0xf1   : > { %s4053_s25 = smov [#allocation29]   ;;  %s5196_s17 = sld [smem:[#allocation74_spill]] }
  0xf2   : > { %s745_s0 = sshll.u32 %s4053_s25, 4  ;;  %s746_s0 = int_to_ptr.vmem [resolvable:$true] %s745_s0 }
  0xf7   : > { %s3502_s1 = scalar_lea.hbm %s5196_s17, 32 }
  0xf8   : > { %p3503_p13 = scmp.ne.s32.totalorder %s5196_s17, %s3502_s1  ;;  %p3509_p3 = scmp.lt.u32.totalorder %s3502_s1, %s5196_s17 }
  0xfa   : > { %p3505_p0 = pnand %p3503_p13, %p4247_p8 }
  0xfc   : > { %p3506_p1 = pneg %p3505_p0 }
  0xfe   : > { %p3511_p2 = pnand %p3509_p3, %p3506_p1 }
 0x100   : > { %3514 = shalt.err (!%p3511_p2)
}
 0x101   : > { %s3515_s19 = scalar_lea.vmem %s746_s0, 32  ;;  %p3523_p10 = scmp.lt.s32.totalorder %s746_s0, %s746_s0 }
 0x102   : > { %p3516_p5 = scmp.ne.s32.totalorder %s746_s0, %s3515_s19  ;;  %p3524_p4 = scmp.lt.s32.totalorder %s3515_s19, %s3515_s19 }
 0x104   : > { %p3518_p7 = pnand %p3516_p5, %p4247_p8  ;;  %p3525_p11 = por %p3524_p4, %p3523_p10 }
 0x106   : > { %p3519_p9 = pneg %p3518_p7 }
 0x108   : > { %p3526_p12 = pnand %p3525_p11, %p3519_p9 }
 0x10a   : > { %3529 = shalt.err (!%p3526_p12)
}
 0x10b   : > { %3139 = dma.hbm_to_vmem [thread:$0]  (!%p4231_p6), %s5196_s17, 32, %s746_s0, [#allocation30]  }
 0x10c   : > { %s5138_s18 = sadd.s32 4294967294, %s4044_s30   ;;  %s4407_s25 = sadd.s32 1, %s4044_s30  }
 0x10d   : > { %5197 = sst [smem:[#allocation54_spill]] %s4407_s25  ;;  %s60_s16 = ssub.s32 %s4044_s30, %s4407_s25 }
 0x10e   : > { %s63_s20 = sadd.s32 1, %s4040_s29  ;;  %p61_p13 = scmp.eq.s32.totalorder %s60_s16, 0 }
 0x10f   : > { %p70_p0 = scmp.ne.s32.totalorder %s4040_s29, %s4036_s28  ;;  %p71_p1 = scmp.eq.s32.totalorder %s4044_s30, 0 }
 0x110   : > { %p76_p3 = scmp.ne.s32.totalorder %s4036_s28, %s4032_s3  ;;  %p5199_p5 = scmp.eq.s32.totalorder %s4213_s23, 0 }
 0x111   : > { %s4418_s1 = scalar_select %p61_p13, %s4040_s29, %s63_s20  }
 0x112   : > { %p72_p2 = por %p71_p1, %p70_p0  ;;  %p4422_p7 = por %p5199_p5, %p76_p3 }
 0x113   : > { %5198 = sst [smem:[#allocation55_spill]] %s4418_s1  ;;  %p514_p9 = scmp.eq.s32.totalorder %s4213_s23, 1 }
 0x114   : > { %s5200_s0 = scalar_select %p4422_p7, 1, 0 }
 0x115   : > { %p520_p10 = scmp.eq.s32.totalorder %s5138_s18, 1  ;;  %p3185_p4 = scmp.lt.s32.totalorder %s4044_s30, 2 }
 0x116   : > { %s5140_s4 = sand.u32 1, %s4040_s29   ;;  %p4431_p11 = por %p514_p9, %p70_p0 }
 0x117   : > { %p4435_p12 = por %p520_p10, %p76_p3  ;;  %s4441_s24 = sshll.u32 %s5140_s4, 3 }
 0x118   : > { %s5201_s2 = scalar_select %p4431_p11, 1, 0 }
 0x119   : > { %s5202_s22 = scalar_select %p4435_p12, 1, 0 }
 0x11a   : > { %s4444_s19 = sshll.u32 %s4044_s30, 7  ;;  %p4446_p13 = pnand %p3185_p4, %p72_p2 }
 0x11b   : > { %5203 = sst [smem:[#allocation56_spill]] %s5202_s22  ;;  %s5142_s14 = sand.u32 1, %s4044_s30  }
 0x11c   : > { %s5204_s27 = scalar_select %p4446_p13, 1, 0 }
 0x11d   : > { %s5205_s18 = sld [smem:[#allocation58_spill]]  ;;  %s800_s4 = scalar_lea.vmem [#allocation5], %s4441_s24 }
 0x11e   : > { %s807_s7 = sshll.u32 %s800_s4, 4  ;;  %s4462_s9 = scalar_lea.sflag [#allocation6], %s5142_s14  ;;  %s4458_s7 = int_to_ptr.vmem [resolvable:$true] %s807_s7 }
 0x11f   : > { %p4468_p1 = pneg %p4446_p13 }
 0x121   : > { %s5206_s13 = scalar_select %p4468_p1, 1, 0 }
 0x123   : > { %s4455_s5 = scalar_lea.hbm %s5205_s18, %s4444_s19  ;;  %s3535_s4 = scalar_lea.hbm %s5205_s18, 256 }
 0x124   : > { %s3530_s11 = scalar_lea.hbm %s4455_s5, 128  ;;  %p3536_p5 = scmp.lt.u32.totalorder %s4455_s5, %s5205_s18 }
 0x125   : > { %p3531_p0 = scmp.ne.s32.totalorder %s4455_s5, %s3530_s11  ;;  %p3537_p9 = scmp.lt.u32.totalorder %s3535_s4, %s3530_s11 }
 0x126   : > { %p3539_p4 = scmp.lt.u32.totalorder %s3530_s11, %s4455_s5 }
 0x127   : > { %p3533_p3 = pnand %p4468_p1, %p3531_p0  ;;  %p3538_p10 = por %p3537_p9, %p3536_p5 }
 0x129   : > { %p3534_p2 = pneg %p3533_p3  ;;  %p3540_p12 = por %p3539_p4, %p3538_p10 }
 0x12b   : > { %p3541_p11 = pnand %p3540_p12, %p3534_p2 }
 0x12d   : > { %3544 = shalt.err (!%p3541_p11)
}
 0x12e   : > { %s3545_s14 = scalar_lea.vmem %s4458_s7, 128  ;;  %s4054_s16 = smov [#allocation5]  }
 0x12f   : > { %p3546_p0 = scmp.ne.s32.totalorder %s4458_s7, %s3545_s14  ;;  %s3550_s20 = sshll.u32 %s4054_s16, 4  ;;  %s3551_s20 = int_to_ptr.vmem [resolvable:$false] %s3550_s20 }
 0x130   : > { %s3552_s15 = scalar_lea.vmem %s3551_s20, 256  ;;  %p3553_p6 = scmp.lt.s32.totalorder %s4458_s7, %s3551_s20 }
 0x131   : > { %p3548_p3 = pnand %p3546_p0, %p4468_p1  ;;  %p3554_p8 = scmp.lt.s32.totalorder %s3552_s15, %s3545_s14 }
 0x133   : > { %p3549_p7 = pneg %p3548_p3  ;;  %p3555_p5 = por %p3554_p8, %p3553_p6 }
 0x135   : > { %p3556_p9 = pnand %p3555_p5, %p3549_p7 }
 0x137   : > { %3559 = shalt.err (!%p3556_p9)
}
 0x138   : > { %3152 = dma.hbm_to_vmem [thread:$0]  (!%p4446_p13), %s4455_s5, 128, %s4458_s7, %s4462_s9  }
 0x139   : > { %s4055_s11 = smov [#allocation13]   ;;  %s5207_s16 = sld [smem:[#allocation63_spill]] }
 0x13a   : > { %s613_s17 = sshll.u32 %s4055_s11, 4  ;;  %p5208_p8 = scmp.ne.s32.totalorder %s5189_s6, 0  ;;  %s614_s17 = int_to_ptr.vmem [resolvable:$true] %s613_s17 }
 0x13f   : > { %s3560_s21 = scalar_lea.hbm %s5207_s16, 512 }
 0x140   : > { %p3561_p6 = scmp.ne.s32.totalorder %s5207_s16, %s3560_s21  ;;  %p3567_p12 = scmp.lt.u32.totalorder %s3560_s21, %s5207_s16 }
 0x142   : > { %p3563_p7 = pnand %p3561_p6, %p5208_p8 }
 0x144   : > { %p3564_p11 = pneg %p3563_p7 }
 0x146   : > { %p3569_p2 = pnand %p3567_p12, %p3564_p11 }
 0x148   : > { %3572 = shalt.err (!%p3569_p2)
}
 0x149   : > { %s3573_s7 = scalar_lea.vmem %s614_s17, 512  ;;  %p3581_p3 = scmp.lt.s32.totalorder %s614_s17, %s614_s17 }
 0x14a   : > { %p3574_p10 = scmp.ne.s32.totalorder %s614_s17, %s3573_s7  ;;  %p3582_p5 = scmp.lt.s32.totalorder %s3573_s7, %s3573_s7 }
 0x14c   : > { %p3576_p4 = pnand %p3574_p10, %p5208_p8  ;;  %p3583_p9 = por %p3582_p5, %p3581_p3 }
 0x14e   : > { %p3577_p0 = pneg %p3576_p4 }
 0x150   : > { %p3584_p13 = pnand %p3583_p9, %p3577_p0 }
 0x152   : > { %3587 = shalt.err (!%p3584_p13)
}
 0x153   : > { %s4056_s5 = smov 64   ;;  %s4057_s18 = smov 4  }
 0x154   : > { %p5209_p6 = scmp.ne.s32.totalorder %s5187_s26, 0  ;;  %s4058_s11 = smov [#allocation16]  }
 0x155   : > { %s637_s4 = sshll.u32 %s4058_s11, 4  ;;  %s4059_s20 = smov [#allocation19]   ;;  %s638_s4 = int_to_ptr.vmem [resolvable:$true] %s637_s4 }
 0x156   : > { %3106 = dma.hbm_to_vmem [thread:$0]  (!%p5209_p6), %s5207_s16, 512, %s614_s17, [#allocation12], %s4056_s5, %s4056_s5, %s4057_s18  }
 0x157   : > { %s661_s14 = sshll.u32 %s4059_s20, 4  ;;  %s5210_s8 = sld [smem:[#allocation65_spill]]  ;;  %s4513_s14 = int_to_ptr.vmem [resolvable:$true] %s661_s14 }
 0x15d   : > { %s3588_s25 = scalar_lea.hbm %s5210_s8, 512 }
 0x15e   : > { %p3589_p13 = scmp.ne.s32.totalorder %s5210_s8, %s3588_s25  ;;  %p3595_p12 = scmp.lt.u32.totalorder %s3588_s25, %s5210_s8 }
 0x160   : > { %p3591_p7 = pnand %p3589_p13, %p5208_p8 }
 0x162   : > { %p3592_p11 = pneg %p3591_p7 }
 0x164   : > { %p3597_p2 = pnand %p3595_p12, %p3592_p11 }
 0x166   : > { %3600 = shalt.err (!%p3597_p2)
}
 0x167   : > { %s3601_s1 = scalar_lea.vmem %s638_s4, 512  ;;  %p3609_p3 = scmp.lt.s32.totalorder %s638_s4, %s638_s4 }
 0x168   : > { %p3602_p10 = scmp.ne.s32.totalorder %s638_s4, %s3601_s1  ;;  %p3610_p5 = scmp.lt.s32.totalorder %s3601_s1, %s3601_s1 }
 0x16a   : > { %p3604_p4 = pnand %p3602_p10, %p5208_p8  ;;  %p3611_p9 = por %p3610_p5, %p3609_p3 }
 0x16c   : > { %p3605_p0 = pneg %p3604_p4 }
 0x16e   : > { %p3612_p1 = pnand %p3611_p9, %p3605_p0 }
 0x170   : > { %3615 = shalt.err (!%p3612_p1)
}
 0x171   : > { %3112 = dma.hbm_to_vmem [thread:$0]  (!%p5209_p6), %s5210_s8, 512, %s638_s4, [#allocation15], %s4056_s5, %s4056_s5, %s4057_s18  }
 0x172   : > { %s5211_s10 = sld [smem:[#allocation67_spill]] }
 0x178   : > { %s3616_s20 = scalar_lea.hbm %s5211_s10, 512 }
 0x179   : > { %p3617_p13 = scmp.ne.s32.totalorder %s5211_s10, %s3616_s20  ;;  %p3623_p11 = scmp.lt.u32.totalorder %s3616_s20, %s5211_s10 }
 0x17b   : > { %p3619_p1 = pnand %p3617_p13, %p5208_p8 }
 0x17d   : > { %p3620_p7 = pneg %p3619_p1 }
 0x17f   : > { %p3625_p12 = pnand %p3623_p11, %p3620_p7 }
 0x181   : > { %3628 = shalt.err (!%p3625_p12)
}
 0x182   : > { %s3629_s4 = scalar_lea.vmem %s4513_s14, 512  ;;  %p3637_p0 = scmp.lt.s32.totalorder %s4513_s14, %s4513_s14 }
 0x183   : > { %p3630_p2 = scmp.ne.s32.totalorder %s4513_s14, %s3629_s4  ;;  %p3638_p3 = scmp.lt.s32.totalorder %s3629_s4, %s3629_s4 }
 0x185   : > { %p3632_p10 = pnand %p3630_p2, %p5208_p8  ;;  %p3639_p5 = por %p3638_p3, %p3637_p0 }
 0x187   : > { %p3633_p4 = pneg %p3632_p10 }
 0x189   : > { %p3640_p9 = pnand %p3639_p5, %p3633_p4 }
 0x18b   : > { %3643 = shalt.err (!%p3640_p9)
}
 0x18c   : > { %3118 = dma.hbm_to_vmem [thread:$0]  (!%p5209_p6), %s5211_s10, 512, %s4513_s14, [#allocation18], %s4056_s5, %s4056_s5, %s4057_s18  }
 0x18d   : > { %s4060_s25 = smov [#allocation22]   ;;  %s4061_s11 = smov [#allocation25]  }
 0x18e   : > { %s686_s22 = sshll.u32 %s4060_s25, 4  ;;  %s707_s20 = sshll.u32 %s4061_s11, 4  ;;  %s687_s22 = int_to_ptr.vmem [resolvable:$true] %s686_s22  ;;  %s4562_s20 = int_to_ptr.vmem [resolvable:$true] %s707_s20 }
 0x18f   : > { %s5212_s12 = sld [smem:[#allocation69_spill]] }
 0x195   : > { %s3644_s21 = scalar_lea.hbm %s5212_s12, 32 }
 0x196   : > { %p3645_p13 = scmp.ne.s32.totalorder %s5212_s12, %s3644_s21  ;;  %p3651_p11 = scmp.lt.u32.totalorder %s3644_s21, %s5212_s12 }
 0x198   : > { %p3647_p1 = pnand %p3645_p13, %p5208_p8 }
 0x19a   : > { %p3648_p7 = pneg %p3647_p1 }
 0x19c   : > { %p3653_p12 = pnand %p3651_p11, %p3648_p7 }
 0x19e   : > { %3656 = shalt.err (!%p3653_p12)
}
 0x19f   : > { %s3657_s3 = scalar_lea.vmem %s687_s22, 32  ;;  %p3665_p0 = scmp.lt.s32.totalorder %s687_s22, %s687_s22 }
 0x1a0   : > { %p3658_p2 = scmp.ne.s32.totalorder %s687_s22, %s3657_s3  ;;  %p3666_p3 = scmp.lt.s32.totalorder %s3657_s3, %s3657_s3 }
 0x1a2   : > { %p3660_p10 = pnand %p3658_p2, %p5208_p8  ;;  %p3667_p5 = por %p3666_p3, %p3665_p0 }
 0x1a4   : > { %p3661_p4 = pneg %p3660_p10 }
 0x1a6   : > { %p3668_p9 = pnand %p3667_p5, %p3661_p4 }
 0x1a8   : > { %3671 = shalt.err (!%p3668_p9)
}
 0x1a9   : > { %3124 = dma.hbm_to_vmem [thread:$0]  (!%p5209_p6), %s5212_s12, 32, %s687_s22, [#allocation21]  }
 0x1aa   : > { %s5213_s21 = sld [smem:[#allocation71_spill]] }
 0x1b0   : > { %s3672_s17 = scalar_lea.hbm %s5213_s21, 512 }
 0x1b1   : > { %p3673_p13 = scmp.ne.s32.totalorder %s5213_s21, %s3672_s17  ;;  %p3679_p11 = scmp.lt.u32.totalorder %s3672_s17, %s5213_s21 }
 0x1b3   : > { %p3675_p1 = pnand %p3673_p13, %p5208_p8 }
 0x1b5   : > { %p3676_p7 = pneg %p3675_p1 }
 0x1b7   : > { %p3681_p12 = pnand %p3679_p11, %p3676_p7 }
 0x1b9   : > { %3684 = shalt.err (!%p3681_p12)
}
 0x1ba   : > { %s3685_s22 = scalar_lea.vmem %s4562_s20, 512  ;;  %p3693_p0 = scmp.lt.s32.totalorder %s4562_s20, %s4562_s20 }
 0x1bb   : > { %p3686_p2 = scmp.ne.s32.totalorder %s4562_s20, %s3685_s22  ;;  %p3694_p3 = scmp.lt.s32.totalorder %s3685_s22, %s3685_s22 }
 0x1bd   : > { %p3688_p10 = pnand %p3686_p2, %p5208_p8  ;;  %p3695_p5 = por %p3694_p3, %p3693_p0 }
 0x1bf   : > { %p3689_p4 = pneg %p3688_p10 }
 0x1c1   : > { %p3696_p9 = pnand %p3695_p5, %p3689_p4 }
 0x1c3   : > { %3699 = shalt.err (!%p3696_p9)
}
 0x1c4   : > { %3130 = dma.hbm_to_vmem [thread:$0]  (!%p5209_p6), %s5213_s21, 512, %s4562_s20, [#allocation24], %s4056_s5, %s4056_s5, %s4057_s18  }
 0x1c5   : > { %s4062_s15 = smov [#allocation28]   ;;  %s4063_s17 = smov [#allocation31]  }
 0x1c6   : > { %s731_s7 = sshll.u32 %s4062_s15, 4  ;;  %s756_s4 = sshll.u32 %s4063_s17, 4  ;;  %s732_s7 = int_to_ptr.vmem [resolvable:$true] %s731_s7  ;;  %s4608_s4 = int_to_ptr.vmem [resolvable:$true] %s756_s4 }
 0x1c7   : > { %s5214_s3 = sld [smem:[#allocation73_spill]] }
 0x1cd   : > { %s5215_s22 = smov %s5214_s3  ;;  %s3700_s8 = scalar_lea.hbm %s5214_s3, 512 }
 0x1ce   : > { %p3701_p13 = scmp.ne.s32.totalorder %s5215_s22, %s3700_s8  ;;  %p3707_p11 = scmp.lt.u32.totalorder %s3700_s8, %s5215_s22 }
 0x1d0   : > { %p3703_p1 = pnand %p3701_p13, %p5208_p8 }
 0x1d2   : > { %p3704_p7 = pneg %p3703_p1 }
 0x1d4   : > { %p3709_p12 = pnand %p3707_p11, %p3704_p7 }
 0x1d6   : > { %3712 = shalt.err (!%p3709_p12)
}
 0x1d7   : > { %s3713_s11 = scalar_lea.vmem %s732_s7, 512  ;;  %p3721_p0 = scmp.lt.s32.totalorder %s732_s7, %s732_s7 }
 0x1d8   : > { %p3714_p2 = scmp.ne.s32.totalorder %s732_s7, %s3713_s11  ;;  %p3722_p3 = scmp.lt.s32.totalorder %s3713_s11, %s3713_s11 }
 0x1da   : > { %p3716_p10 = pnand %p3714_p2, %p5208_p8  ;;  %p3723_p5 = por %p3722_p3, %p3721_p0 }
 0x1dc   : > { %p3717_p4 = pneg %p3716_p10 }
 0x1de   : > { %p3724_p9 = pnand %p3723_p5, %p3717_p4 }
 0x1e0   : > { %3727 = shalt.err (!%p3724_p9)
}
 0x1e1   : > { %3136 = dma.hbm_to_vmem [thread:$0]  (!%p5209_p6), %s5215_s22, 512, %s732_s7, [#allocation27], %s4056_s5, %s4056_s5, %s4057_s18  }
 0x1e2   : > { %s5216_s17 = sld [smem:[#allocation75_spill]] }
 0x1e8   : > { %s3728_s1 = scalar_lea.hbm %s5216_s17, 16 }
 0x1e9   : > { %p3729_p13 = scmp.ne.s32.totalorder %s5216_s17, %s3728_s1  ;;  %p3735_p11 = scmp.lt.u32.totalorder %s3728_s1, %s5216_s17 }
 0x1eb   : > { %p3731_p1 = pnand %p3729_p13, %p5208_p8 }
 0x1ed   : > { %p3732_p7 = pneg %p3731_p1 }
 0x1ef   : > { %p3737_p12 = pnand %p3735_p11, %p3732_p7 }
 0x1f1   : > { %3740 = shalt.err (!%p3737_p12)
}
 0x1f2   : > { %s3741_s5 = scalar_lea.vmem %s4608_s4, 16  ;;  %s3748_s18 = scalar_lea.vmem %s4608_s4, 32 }
 0x1f3   : > { %p3742_p2 = scmp.ne.s32.totalorder %s4608_s4, %s3741_s5  ;;  %p3749_p0 = scmp.lt.s32.totalorder %s4608_s4, %s4608_s4 }
 0x1f4   : > { %p3750_p3 = scmp.lt.s32.totalorder %s3748_s18, %s3741_s5 }
 0x1f5   : > { %p3744_p10 = pnand %p3742_p2, %p5208_p8 }
 0x1f6   : > { %p3751_p5 = por %p3750_p3, %p3749_p0 }
 0x1f7   : > { %p3745_p4 = pneg %p3744_p10 }
 0x1f9   : > { %p3752_p9 = pnand %p3751_p5, %p3745_p4 }
 0x1fb   : > { %3755 = shalt.err (!%p3752_p9)
}
 0x1fc   : > { %3142 = dma.hbm_to_vmem [thread:$0]  (!%p5209_p6), %s5216_s17, 16, %s4608_s4, [#allocation30]  }
 0x1fd   : > { %s4064_s10 = smov [#allocation32]   ;;  %s5217_s1 = sld [smem:[#allocation57_spill]] }
 0x1fe   : > { %s767_s8 = sshll.u32 %s4064_s10, 4  ;;  %s5218_s20 = sld [smem:[#allocation76_spill]]  ;;  %s768_s8 = int_to_ptr.vmem [resolvable:$true] %s767_s8 }
 0x203   : > { %s4659_s14 = scalar_lea.hbm %s5217_s1, %s4444_s19 }
 0x204   : > { %s3756_s5 = scalar_lea.hbm %s5218_s20, 16 }
 0x205   : > { %p3757_p13 = scmp.ne.s32.totalorder %s5218_s20, %s3756_s5  ;;  %p3763_p11 = scmp.lt.u32.totalorder %s3756_s5, %s5218_s20 }
 0x207   : > { %p3759_p1 = pnand %p3757_p13, %p5208_p8 }
 0x209   : > { %p3760_p7 = pneg %p3759_p1 }
 0x20b   : > { %p3765_p12 = pnand %p3763_p11, %p3760_p7 }
 0x20d   : > { %3768 = shalt.err (!%p3765_p12)
}
 0x20e   : > { %s3769_s11 = scalar_lea.vmem %s768_s8, 16  ;;  %s3776_s10 = scalar_lea.vmem %s768_s8, 32 }
 0x20f   : > { %p3770_p2 = scmp.ne.s32.totalorder %s768_s8, %s3769_s11  ;;  %p3777_p0 = scmp.lt.s32.totalorder %s768_s8, %s768_s8 }
 0x210   : > { %p3778_p3 = scmp.lt.s32.totalorder %s3776_s10, %s3769_s11 }
 0x211   : > { %p3772_p10 = pnand %p3770_p2, %p5208_p8 }
 0x212   : > { %p3779_p5 = por %p3778_p3, %p3777_p0 }
 0x213   : > { %p3773_p4 = pneg %p3772_p10 }
 0x215   : > { %p3780_p9 = pnand %p3779_p5, %p3773_p4 }
 0x217   : > { %3783 = shalt.err (!%p3780_p9)
}
 0x218   : > { %3145 = dma.hbm_to_vmem [thread:$0]  (!%p5209_p6), %s5218_s20, 16, %s768_s8, [#allocation33]  }
 0x219   : > { %s782_s6 = scalar_lea.vmem [#allocation2], %s4441_s24  ;;  %s5219_s5 = sld [smem:[#allocation59_spill]] }
 0x21a   : > { %s789_s15 = sshll.u32 %s782_s6, 4  ;;  %s5220_s18 = sand.u32 1, %s4040_s29   ;;  %s4680_s15 = int_to_ptr.vmem [resolvable:$true] %s789_s15 }
 0x21b   : > { %s779_s4 = scalar_lea.sflag [#allocation3], %s5220_s18  ;;  %s3784_s7 = scalar_lea.hbm %s4659_s14, 128 }
 0x21c   : > { %p3785_p8 = scmp.ne.s32.totalorder %s4659_s14, %s3784_s7  ;;  %p5221_p13 = scmp.ne.s32.totalorder %s5206_s13, 0 }
 0x21d   : > { %s3789_s8 = scalar_lea.hbm %s5217_s1, 256  ;;  %p3790_p6 = scmp.lt.u32.totalorder %s4659_s14, %s5217_s1 }
 0x21e   : > { %p3787_p1 = pnand %p3785_p8, %p5221_p13  ;;  %p3791_p11 = scmp.lt.u32.totalorder %s3789_s8, %s3784_s7 }
 0x21f   : > { %s4686_s26 = scalar_lea.hbm %s5219_s5, %s4444_s19  ;;  %p3793_p2 = scmp.lt.u32.totalorder %s3784_s7, %s4659_s14 }
 0x220   : > { %p3788_p7 = pneg %p3787_p1  ;;  %p3792_p12 = por %p3791_p11, %p3790_p6 }
 0x222   : > { %p3794_p10 = por %p3793_p2, %p3792_p12 }
 0x224   : > { %p3795_p4 = pnand %p3794_p10, %p3788_p7 }
 0x226   : > { %3798 = shalt.err (!%p3795_p4)
}
 0x227   : > { %s3799_s6 = scalar_lea.vmem %s4680_s15, 128  ;;  %s4065_s3 = smov [#allocation2]  }
 0x228   : > { %p3800_p0 = scmp.ne.s32.totalorder %s4680_s15, %s3799_s6  ;;  %s3804_s25 = sshll.u32 %s4065_s3, 4  ;;  %s3805_s25 = int_to_ptr.vmem [resolvable:$false] %s3804_s25 }
 0x229   : > { %s3806_s18 = scalar_lea.vmem %s3805_s25, 256  ;;  %p3807_p9 = scmp.lt.s32.totalorder %s4680_s15, %s3805_s25 }
 0x22a   : > { %p3802_p3 = pnand %p3800_p0, %p5221_p13  ;;  %p3808_p8 = scmp.lt.s32.totalorder %s3806_s18, %s3799_s6 }
 0x22c   : > { %p3803_p5 = pneg %p3802_p3  ;;  %p3809_p1 = por %p3808_p8, %p3807_p9 }
 0x22e   : > { %p3810_p6 = pnand %p3809_p1, %p3803_p5 }
 0x230   : > { %3813 = shalt.err (!%p3810_p6)
}
 0x231   : > { %p5222_p7 = scmp.ne.s32.totalorder %s5204_s27, 0  ;;  %s818_s7 = scalar_lea.vmem [#allocation7], %s4441_s24 }
 0x232   : > { %s825_s11 = sshll.u32 %s818_s7, 4  ;;  %s5223_s16 = sld [smem:[#allocation60_spill]]  ;;  %s826_s11 = int_to_ptr.vmem [resolvable:$true] %s825_s11 }
 0x233   : > { %3149 = dma.hbm_to_vmem [thread:$0]  (!%p5222_p7), %s4659_s14, 128, %s4680_s15, %s779_s4  }
 0x234   : > { %s3814_s6 = scalar_lea.hbm %s4686_s26, 128  ;;  %s3819_s18 = scalar_lea.hbm %s5219_s5, 256 }
 0x235   : > { %p3815_p11 = scmp.ne.s32.totalorder %s4686_s26, %s3814_s6  ;;  %p3820_p10 = scmp.lt.u32.totalorder %s4686_s26, %s5219_s5 }
 0x236   : > { %p3821_p4 = scmp.lt.u32.totalorder %s3819_s18, %s3814_s6  ;;  %p3823_p3 = scmp.lt.u32.totalorder %s3814_s6, %s4686_s26 }
 0x237   : > { %p3817_p12 = pnand %p3815_p11, %p5221_p13 }
 0x238   : > { %s4716_s12 = scalar_lea.hbm %s5223_s16, %s4444_s19  ;;  %p3822_p0 = por %p3821_p4, %p3820_p10 }
 0x239   : > { %p3818_p2 = pneg %p3817_p12 }
 0x23a   : > { %p3824_p5 = por %p3823_p3, %p3822_p0 }
 0x23c   : > { %p3825_p9 = pnand %p3824_p5, %p3818_p2 }
 0x23e   : > { %3828 = shalt.err (!%p3825_p9)
}
 0x23f   : > { %s3829_s19 = scalar_lea.vmem %s826_s11, 128  ;;  %s4066_s14 = smov [#allocation7]  }
 0x240   : > { %p3830_p8 = scmp.ne.s32.totalorder %s826_s11, %s3829_s19  ;;  %s3834_s15 = sshll.u32 %s4066_s14, 4  ;;  %s3835_s15 = int_to_ptr.vmem [resolvable:$false] %s3834_s15 }
 0x241   : > { %s3836_s4 = scalar_lea.vmem %s3835_s15, 256  ;;  %p3837_p11 = scmp.lt.s32.totalorder %s826_s11, %s3835_s15 }
 0x242   : > { %p3832_p1 = pnand %p3830_p8, %p5221_p13  ;;  %p3838_p12 = scmp.lt.s32.totalorder %s3836_s4, %s3829_s19 }
 0x244   : > { %p3833_p6 = pneg %p3832_p1  ;;  %p3839_p7 = por %p3838_p12, %p3837_p11 }
 0x246   : > { %p3840_p4 = pnand %p3839_p7, %p3833_p6 }
 0x248   : > { %3843 = shalt.err (!%p3840_p4)
}
 0x249   : > { %p5224_p10 = scmp.ne.s32.totalorder %s5204_s27, 0  ;;  %s836_s17 = scalar_lea.vmem [#allocation8], %s4441_s24 }
 0x24a   : > { %s843_s1 = sshll.u32 %s836_s17, 4  ;;  %s5225_s7 = sand.u32 1, %s4044_s30   ;;  %s844_s1 = int_to_ptr.vmem [resolvable:$true] %s843_s1 }
 0x24b   : > { %3155 = dma.hbm_to_vmem [thread:$0]  (!%p5224_p10), %s4686_s26, 128, %s826_s11, %s4462_s9  }
 0x24c   : > { %s833_s10 = scalar_lea.sflag [#allocation9], %s5225_s7  ;;  %s3844_s8 = scalar_lea.hbm %s4716_s12, 128 }
 0x24d   : > { %p3845_p7 = scmp.ne.s32.totalorder %s4716_s12, %s3844_s8  ;;  %s3849_s25 = scalar_lea.hbm %s5223_s16, 256 }
 0x24e   : > { %p3850_p3 = scmp.lt.u32.totalorder %s4716_s12, %s5223_s16  ;;  %p3851_p5 = scmp.lt.u32.totalorder %s3849_s25, %s3844_s8 }
 0x24f   : > { %p3847_p2 = pnand %p3845_p7, %p5221_p13  ;;  %p3853_p8 = scmp.lt.u32.totalorder %s3844_s8, %s4716_s12 }
 0x250   : > { %p3852_p9 = por %p3851_p5, %p3850_p3 }
 0x251   : > { %p3848_p0 = pneg %p3847_p2 }
 0x252   : > { %p3854_p1 = por %p3853_p8, %p3852_p9 }
 0x254   : > { %p3855_p6 = pnand %p3854_p1, %p3848_p0 }
 0x256   : > { %3858 = shalt.err (!%p3855_p6)
}
 0x257   : > { %s3859_s9 = scalar_lea.vmem %s844_s1, 128  ;;  %s4067_s24 = smov [#allocation8]  }
 0x258   : > { %p3860_p11 = scmp.ne.s32.totalorder %s844_s1, %s3859_s9  ;;  %s3864_s26 = sshll.u32 %s4067_s24, 4  ;;  %s3865_s26 = int_to_ptr.vmem [resolvable:$false] %s3864_s26 }
 0x259   : > { %s3866_s11 = scalar_lea.vmem %s3865_s26, 256  ;;  %p3867_p7 = scmp.lt.s32.totalorder %s844_s1, %s3865_s26 }
 0x25a   : > { %p3862_p12 = pnand %p3860_p11, %p5221_p13  ;;  %p3868_p2 = scmp.lt.s32.totalorder %s3866_s11, %s3859_s9 }
 0x25c   : > { %p3863_p4 = pneg %p3862_p12  ;;  %p3869_p10 = por %p3868_p2, %p3867_p7 }
 0x25e   : > { %p3870_p3 = pnand %p3869_p10, %p3863_p4 }
 0x260   : > { %3873 = shalt.err (!%p3870_p3)
}
 0x261   : > { %p5226_p5 = scmp.ne.s32.totalorder %s5204_s27, 0  ;;  %s5227_s14 = sld [smem:[#allocation53_spill]] }
 0x263   : > { %3158 = dma.hbm_to_vmem [thread:$0]  (!%p5226_p5), %s4716_s12, 128, %s844_s1, %s833_s10  }
 0x267   : > { %p5228_p0 = scmp.ne.s32.totalorder %s5227_s14, 0 }
 0x268   : > { %s4759_s13 = sand.u32 (!%p5228_p0), 1, %s4036_s28   ;;  %p5229_p13 = scmp.ne.s32.totalorder (!%p5228_p0), %s5200_s0, 0 }
 0x269   : > { %852 = sbr.rel (%p5228_p0) target bundleno = 6103 (0x17d7), region = 100  ;;  %s4762_s15 = sshll.u32 (!%p5228_p0), %s4759_s13, 3 }
 0x26a   : > { %s855_s4 = scalar_lea.sflag (!%p5228_p0), [#allocation3], %s4759_s13  ;;  %s858_s17 = scalar_lea.vmem (!%p5228_p0), [#allocation2], %s4762_s15 }
 0x270   : > { %3975 = dma.done.wait (%p5229_p13), %s855_s4, 128  }
 0x271   : > { %3977 = vsyncadd (%p5229_p13), %s855_s4, 4294967168  ;;  %s4771_s27 = sand.u32 1, %s4213_s23   ;;  %s867_s1 = scalar_lea.vmem [#allocation5], %s4762_s15 }
 0x272   : > { %s864_s12 = scalar_lea.sflag [#allocation6], %s4771_s27 }
 0x273   : > { %3979 = dma.done.wait (%p5229_p13), %s864_s12, 256  }
 0x274   : > { %3981 = vsyncadd (%p5229_p13), %s864_s12, 4294967040  ;;  %s876_s7 = scalar_lea.vmem [#allocation7], %s4762_s15  ;;  %s882_s10 = scalar_lea.sflag [#allocation9], %s4771_s27 }
 0x275   : > { %s885_s8 = scalar_lea.vmem [#allocation8], %s4762_s15 }
 0x276   : > { %3983 = dma.done.wait (%p5229_p13), %s882_s10, 128  }
 0x277   : > { %3985 = vsyncadd (%p5229_p13), %s882_s10, 4294967168  ;;  %p5230_p10 = scmp.eq.s32.totalorder %s4213_s23, 0 }
 0x279   : > { %3987 = dma.done.wait (%p5230_p10), [#allocation9], 32   ;;  %p5231_p9 = pmov %p5230_p10 }
 0x27b   : > { %3989 = vsyncadd (%p5231_p9), [#allocation9], 4294967264  ;;  %p5232_p8 = pmov %p5231_p9 }
 0x27d   : > { %3991 = dma.done.wait (%p5232_p8), [#allocation12], 544   ;;  %p5233_p1 = pmov %p5232_p8 }
 0x27f   : > { %3993 = vsyncadd (%p5233_p1), [#allocation12], 4294966752  ;;  %p5234_p6 = pmov %p5233_p1 }
 0x280   : > { %p5235_p11 = pmov %p5233_p1 }
 0x281   : > { %3995 = dma.done.wait (%p5234_p6), [#allocation15], 544  }
 0x282   : > { %3997 = vsyncadd (%p5235_p11), [#allocation15], 4294966752  ;;  %p5236_p12 = pmov %p5233_p1 }
 0x283   : > { %p5237_p4 = pmov %p5233_p1 }
 0x284   : > { %3999 = dma.done.wait (%p5236_p12), [#allocation18], 544  }
 0x285   : > { %4001 = vsyncadd (%p5237_p4), [#allocation18], 4294966752  ;;  %p5238_p7 = pmov %p5233_p1 }
 0x286   : > { %p5239_p2 = pmov %p5233_p1 }
 0x287   : > { %4003 = dma.done.wait (%p5238_p7), [#allocation21], 64  }
 0x288   : > { %4005 = vsyncadd (%p5239_p2), [#allocation21], 4294967232  ;;  %p5240_p3 = pmov %p5233_p1 }
 0x289   : > { %p5241_p5 = pmov %p5233_p1 }
 0x28a   : > { %4007 = dma.done.wait (%p5240_p3), [#allocation24], 544  }
 0x28b   : > { %4009 = vsyncadd (%p5241_p5), [#allocation24], 4294966752  ;;  %p5242_p0 = pmov %p5233_p1 }
 0x28d   : > { %4011 = dma.done.wait (%p5242_p0), [#allocation27], 544   ;;  %p5243_p13 = pmov %p5242_p0 }
 0x28e   : > { %p5244_p10 = pmov %p5242_p0 }
 0x28f   : > { %4013 = vsyncadd (%p5243_p13), [#allocation27], 4294966752 }
 0x290   : > { %4015 = dma.done.wait (%p5244_p10), [#allocation30], 48   ;;  %p5245_p9 = pmov %p5242_p0 }
 0x291   : > { %p5246_p8 = pmov %p5242_p0 }
 0x292   : > { %4017 = vsyncadd (%p5245_p9), [#allocation30], 4294967248 }
 0x293   : > { %4019 = dma.done.wait (%p5246_p8), [#allocation33], 16   ;;  %p5247_p1 = pmov %p5242_p0 }
 0x294   : > { %vm1072_vm0 = vcmask 261120   ;;  %v1036_v0 = vld [vmem:[%s858_s17] sm:$0xff]  ;;  %v4068_v8 = vmov 0.0   ;;  %vm4069_vm1 = vmmov 0   ;;  %vm1230_vm2 = vcmask 130048   ;;  %s4070_s0 = smov 112  }
 0x295   : > { %4021 = vsyncadd (%p5247_p1), [#allocation33], 4294967280  ;;  %v1073_v1 = vsel %vm1072_vm0, %v1036_v0, 0.0  ;;  %v3260_v7 = vld [vmem:[#allocation16] sm:$0xff]   ;;  %2899 = vmatprep.subr.bf16.mxu1 %v4068_v8  ;;  %2891 = vmatprep.subr.bf16.mxu0 %v4068_v8  ;;  %v3261_v9 = vld [vmem:[#allocation16 + $0x8] sm:$0xff]   ;;  %v1158_v10 = vpack.c.bf16 %v1036_v0, %v1036_v0  ;;  %v1038_v44 = vlaneseq  ;;  %vm1327_vm4 = vcmask 64512  }
 0x296   : > { %1074 = vadd.xlane.f32.xlu0 %v1073_v1  ;;  %2900 = vmatpush3.bf16.msra.mxu1 %v3260_v7  ;;  %v3262_v11 = vld [vmem:[#allocation13] sm:$0xff]   ;;  %v3263_v12 = vld [vmem:[#allocation13 + $0x8] sm:$0xff]   ;;  %v2779_v17 = vld [vmem:[#allocation10] ss:$0 sm:$0xff]  ;;  %s4071_s6 = smov 96   ;;  %vm1358_vm5 = vcmask 1043456  }
 0x297   : > { %2901 = vmatprep.subr.bf16.mxu1 %v4068_v8  ;;  %2903 = vmatprep.mubr.msk.bf16.mxu1 %vm4069_vm1, %v4068_v8  ;;  %v2780_v19 = vld [vmem:[#allocation11] ss:$0 sm:$0xff]  ;;  %v2785_v23 = vld [vmem:[#allocation17] ss:$0 sm:$0xff]  ;;  %v2781_v34 = vld [vmem:[#allocation14] ss:$0 sm:$0xff] }
 0x298   : > { %2895 = vmatprep.mubr.msk.bf16.mxu0 %vm4069_vm1, %v4068_v8  ;;  %2892 = vmatpush3.bf16.msra.mxu0 %v3262_v11  ;;  %v4858_v45 = vshrl.u32 %v1038_v44, 7  ;;  %v4860_v46 = vand.u32 127, %v1038_v44  ;;  %s4072_s3 = smov 16   ;;  %s1020_s25 = scalar_lea.vmem [#allocation34], %s4762_s15 }
 0x299   : > { %2893 = vmatprep.subr.bf16.mxu0 %v4068_v8  ;;  %s4987_s18 = sshll.u32 %s4213_s23, 7  ;;  %s5248_s24 = sld [smem:[#allocation77_spill]] }
 0x29a   : > { %2902 = vmatpush3.bf16.msra.mxu1 %v3261_v9  ;;  %vm1042_vm3 = vcmp.ge.s32.totalorder %v4858_v45, %v4860_v46  ;;  %s2353_s11 = sshll.u32 %s1020_s25, 4  ;;  %s2330_s14 = scalar_lea.sflag [#allocation4], %s4759_s13  ;;  %s2354_s11 = int_to_ptr.vmem [resolvable:$true] %s2353_s11 }
 0x29b   : > { %2913 = vmatprep.subr.bf16.mxu1 %v4068_v8  ;;  %s3874_s4 = scalar_lea.vmem %s2354_s11, 128  ;;  %p5249_p11 = scmp.ne.s32.totalorder %s5201_s2, 0 }
 0x29c   : > { %2894 = vmatpush3.bf16.msra.mxu0 %v3263_v12  ;;  %p3875_p6 = scmp.ne.s32.totalorder %s2354_s11, %s3874_s4  ;;  %s4074_s17 = smov [#allocation34]  }
 0x29d   : > { %2904 = vmatmul.mubr.msk.bf16.vlgmr.msra.gmra.mrb[0].mxu1 %vm1072_vm0, %v1158_v10  ;;  %2907 = vmatprep.subr.bf16.mxu0 %v4068_v8  ;;  %s3878_s12 = sshll.u32 %s4074_s17, 4  ;;  %s3879_s12 = int_to_ptr.vmem [resolvable:$false] %s3878_s12 }
 0x29e   : > { %2915 = vmatprep.mubr.msk.bf16.mxu1 %vm4069_vm1, %v4068_v8  ;;  %p3876_p12 = pnand %p3875_p6, %p5249_p11  ;;  %p3881_p7 = scmp.lt.s32.totalorder %s2354_s11, %s3879_s12 }
 0x29f   : > { %s4993_s26 = scalar_lea.hbm %s5248_s24, %s4987_s18 }
 0x2a0   : > { %p3877_p4 = pneg %p3876_p12 }
 0x323   : > { %v1075_v2 = vpop.xlane.xlu0 %1074 }
 0x324   : > { %v1077_v3 = vmul.f32 0.03125, %v1075_v2 }
 0x326   : > { %v1078_v4 = vsub.f32 %v1036_v0, %v1077_v3 }
 0x328   : > { %v1079_v5 = vmul.f32 %v1078_v4, %v1078_v4 }
 0x32a   : > { %v1080_v6 = vsel %vm1072_vm0, %v1079_v5, 0.0 }
 0x32b   : > { %1081 = vadd.xlane.f32.xlu0 %v1080_v6 }
 0x370   : > { %v1212_v24 = vpop.f32.mrb[0].mxu1 }
 0x371   : > { %v1213_v25 = vadd.f32 %v2785_v23, %v1212_v24  ;;  %v2905_v26 = vpop.f32.mrb[1].mxu1 }
 0x372   : > { %v1215_v27 = vpop.f32.mrb[2].mxu1 }
 0x373   : > { %v1228_v28 = vpack.c.bf16 %v1213_v25, %v1213_v25  ;;  %v2906_v29 = vpop.f32.mrb[3].mxu1  ;;  %1225 = vrot.lane.b32.xlu1 %v1213_v25, %s4070_s0 }
 0x375   : > { %v1235_v30 = vsel %vm1230_vm2, %v1228_v28, 0 }
 0x3b8   : > { %v1082_v13 = vpop.xlane.xlu0 %1081 }
 0x3b9   : > { %v1083_v14 = vmul.f32 0.03125, %v1082_v13 }
 0x3bb   : > { %v1084_v15 = vadd.f32 1e-08, %v1083_v14 }
 0x3bd   : > { %3280 = vrsqrt.f32 %v1084_v15 }
 0x3c7   : > { %v3281_v16 = vpop.eup %3280 }
 0x3c8   : > { %v1086_v18 = vmul.f32 %v3281_v16, %v1078_v4 }
 0x3ca   : > { %v1091_v20 = vmul.f32 %v2779_v17, %v1086_v18  ;;  %v3264_v18 = vld [vmem:[#allocation19] sm:$0xff]  }
 0x3cc   : > { %v4839_v21 = vadd.f32 %v2780_v19, %v1091_v20  ;;  %v3265_v19 = vld [vmem:[#allocation19 + $0x8] sm:$0xff]  }
 0x3ce   : > { %v1097_v22 = vpack.c.bf16 %v4839_v21, %v4839_v21 }
 0x3d0   : > { %2896 = vmatmul.mubr.msk.bf16.vlgmr.msra.gmra.mrb[0].mxu0 %vm1072_vm0, %v1097_v22 }
 0x3d1   : > { %2909 = vmatprep.mubr.msk.bf16.mxu0 %vm4069_vm1, %v4068_v8  ;;  %2908 = vmatpush3.bf16.xpose.msra.mxu0 %v1235_v30 }
 0x3d2   : > { %2919 = vmatprep.subr.bf16.mxu0 %v4068_v8 }
 0x3e5   : > { %v1226_v31 = vpop.permute.xlu1 %1225 }
 0x3e6   : > { %v1229_v32 = vpack.c.bf16 %v1226_v31, %v1226_v31 }
 0x3e8   : > { %v1281_v33 = vsel %vm1230_vm2, %v1229_v32, 0 }
 0x3e9   : > { %2914 = vmatpush3.bf16.xpose.msra.mxu1 %v1281_v33 }
 0x3ea   : > { %2925 = vmatprep.subr.bf16.mxu1 %v4068_v8 }
 0x4a3   : > { %v1151_v35 = vpop.f32.mrb[0].mxu0 }
 0x4a4   : > { %v1152_v36 = vadd.f32 %v2781_v34, %v1151_v35  ;;  %v2897_v37 = vpop.f32.mrb[1].mxu0 }
 0x4a5   : > { %v1154_v38 = vpop.f32.mrb[2].mxu0 }
 0x4a6   : > { %v1157_v39 = vmul.f32 0.25, %v1152_v36  ;;  %v2898_v40 = vpop.f32.mrb[3].mxu0 }
 0x4a8   : > { %v1222_v41 = vpack.c.bf16 %v1157_v39, %v1157_v39  ;;  %1219 = vrot.lane.b32.xlu1 %v1157_v39, %s4070_s0 }
 0x4aa   : > { %2910 = vmatmul.mubr.msk.bf16.vlgmr.msra.gmra.mrb[4].mxu0 %vm1230_vm2, %v1222_v41 }
 0x4ab   : > { %2921 = vmatprep.mubr.msk.bf16.mxu0 %vm4069_vm1, %v4068_v8 }
 0x51a   : > { %v1220_v42 = vpop.permute.xlu1 %1219 }
 0x51b   : > { %v1223_v43 = vpack.c.bf16 %v1220_v42, %v1220_v42 }
 0x51d   : > { %2916 = vmatmul.mubr.msk.bf16.vlgmr.msra.gmra.mrb[4].mxu1 %vm1230_vm2, %v1223_v43 }
 0x51e   : > { %2927 = vmatprep.mubr.msk.bf16.mxu1 %vm4069_vm1, %v4068_v8 }
 0x57d   : > { %v1271_v47 = vpop.f32.mrb[4].mxu0 }
 0x57e   : > { %v1325_v48 = vsel %vm1042_vm3, %v1271_v47, -1e+30  ;;  %v2911_v49 = vpop.f32.mrb[5].mxu0  ;;  %v3266_v47 = vld [vmem:[#allocation25] sm:$0xff]  }
 0x57f   : > { %v1274_v50 = vpop.f32.mrb[6].mxu0  ;;  %v1328_v51 = vsel %vm1327_vm4, %v1325_v48, -inf  ;;  %v3268_v49 = vld [vmem:[#allocation28] sm:$0xff]  }
 0x580   : > { %1329 = vmax.xlane.f32.xlu1 %v1328_v51  ;;  %v2912_v52 = vpop.f32.mrb[7].mxu0 }
 0x591   : > { %1353 = vrot.lane.b32.xlu1 %v1228_v28, %s4071_s6 }
 0x5f0   : > { %v1317_v53 = vpop.f32.mrb[4].mxu1 }
 0x5f1   : > { %v1326_v54 = vsel %vm1042_vm3, %v1317_v53, -1e+30  ;;  %v2917_v55 = vpop.f32.mrb[5].mxu1  ;;  %v2797_v53 = vld [vmem:[#allocation22] ss:$0 sm:$0xff] }
 0x5f2   : > { %v1320_v56 = vpop.f32.mrb[6].mxu1  ;;  %v1331_v57 = vsel %vm1327_vm4, %v1326_v54, -inf  ;;  %v2798_v55 = vld [vmem:[#allocation23] ss:$0 sm:$0xff] }
 0x5f3   : > { %1332 = vmax.xlane.f32.xlu0 %v1331_v57  ;;  %v2918_v58 = vpop.f32.mrb[7].mxu1 }
 0x60d   : > { %v1330_v59 = vpop.xlane.xlu1 %1329 }
 0x60e   : > { %v1334_v3 = vsub.f32 %v1325_v48, %v1330_v59  ;;  %v3267_v48 = vld [vmem:[#allocation25 + $0x8] sm:$0xff]  }
 0x60f   : > { %v3269_v59 = vld [vmem:[#allocation28 + $0x8] sm:$0xff]  }
 0x610   : > { %v1336_v4 = vmul.f32 1.442695, %v1334_v3 }
 0x611   : > { %v1354_v60 = vpop.permute.xlu1 %1353 }
 0x612   : > { %v1360_v61 = vsel %vm1358_vm5, %v1354_v60, 0  ;;  %v1037_v60 = vld [vmem:[%s867_s1] sm:$0xff]  ;;  %s3880_s1 = scalar_lea.vmem %s3879_s12, 256 }
 0x613   : > { %2920 = vmatpush3.bf16.msra.mxu0 %v1360_v61  ;;  %v4073_v61 = vmov 0   ;;  %p3882_p2 = scmp.lt.s32.totalorder %s3880_s1, %s3874_s4 }
 0x614   : > { %2931 = vmatprep.subr.bf16.mxu0 %v4068_v8  ;;  %3259 = vset.pattern.permute.xlu0 %v4073_v61 }
 0x615   : > { %p3883_p3 = por %p3882_p2, %p3881_p7 }
 0x617   : > { %p3884_p5 = pnand %p3883_p3, %p3877_p4 }
 0x680   : > { %v1333_v62 = vpop.xlane.xlu0 %1332 }
 0x681   : > { %v1335_v63 = vsub.f32 %v1326_v54, %v1333_v62  ;;  %v2799_v62 = vld [vmem:[#allocation26] ss:$0 sm:$0xff] }
 0x683   : > { %v1338_v0 = vmul.f32 1.442695, %v1335_v63 }
 0x685   : > { %3282 = vpow2.f32 %v1338_v0 }
 0x686   : > { %3284 = vpow2.f32 %v1336_v4 }
 0x68f   : > { %v3283_v1 = vpop.eup %3282 }
 0x690   : > { %v1343_v2 = vsel %vm1327_vm4, %v3283_v1, 0.0  ;;  %v3285_v5 = vpop.eup %3284 }
 0x691   : > { %1344 = vadd.xlane.f32.xlu0 %v1343_v2  ;;  %v1340_v6 = vsel %vm1327_vm4, %v3285_v5, 0.0 }
 0x6a7   : > { %1403 = vrot.lane.b32.xlu0 %v1229_v32, %s4071_s6  ;;  %v2793_v32 = vld [vmem:[#allocation20] ss:$0 sm:$0xff] }
 0x6c6   : > { %1341 = vadd.xlane.f32.xlu0 %v1340_v6  ;;  %v3270_v6 = vld [vmem:[#allocation16 + $0x10] sm:$0xff]  }
 0x71e   : > { %v1345_v7 = vpop.xlane.xlu0 %1344 }
 0x71f   : > { %3286 = vrcp.f32 %v1345_v7  ;;  %v3271_v7 = vld [vmem:[#allocation16 + $0x18] sm:$0xff]  }
 0x722   : > { %v1404_v9 = vpop.permute.xlu0 %1403 }
 0x723   : > { %v1409_v10 = vsel %vm1358_vm5, %v1404_v9, 0  ;;  %v2803_v9 = vld [vmem:[#allocation29] ss:$0 sm:$0xff] }
 0x724   : > { %2926 = vmatpush3.bf16.msra.mxu1 %v1409_v10 }
 0x725   : > { %2939 = vmatprep.subr.bf16.mxu1 %v4068_v8 }
 0x729   : > { %v3287_v11 = vpop.eup %3286 }
 0x72a   : > { %v1349_v12 = vmul.f32 %v3287_v11, %v3283_v1 }
 0x72c   : > { %v1351_v13 = vpack.c.bf16 %v1349_v12, %v1349_v12 }
 0x72e   : > { %2928 = vmatmul.mubr.msk.bf16.vlgmr.msra.gmra.mrb[8].mxu1 %vm1327_vm4, %v1351_v13 }
 0x72f   : > { %2943 = vmatprep.mubr.msk.bf16.mxu1 %vm4069_vm1, %v4068_v8  ;;  %2940 = vmatpush3.bf16.msra.mxu1 %v3266_v47 }
 0x730   : > { %2941 = vmatprep.subr.bf16.mxu1 %v4068_v8 }
 0x733   : > { %2942 = vmatpush3.bf16.msra.mxu1 %v3267_v48 }
 0x734   : > { %2955 = vmatprep.subr.bf16.mxu1 %v4068_v8 }
 0x753   : > { %v1342_v14 = vpop.xlane.xlu0 %1341 }
 0x754   : > { %3288 = vrcp.f32 %v1342_v14 }
 0x75e   : > { %v3289_v15 = vpop.eup %3288 }
 0x75f   : > { %v1348_v16 = vmul.f32 %v3289_v15, %v3285_v5 }
 0x761   : > { %v1350_v17 = vpack.c.bf16 %v1348_v16, %v1348_v16 }
 0x763   : > { %2922 = vmatmul.mubr.msk.bf16.vlgmr.msra.gmra.mrb[8].mxu0 %vm1327_vm4, %v1350_v17 }
 0x764   : > { %2935 = vmatprep.mubr.msk.bf16.mxu0 %vm4069_vm1, %v4068_v8  ;;  %2932 = vmatpush3.bf16.msra.mxu0 %v3264_v18 }
 0x765   : > { %2933 = vmatprep.subr.bf16.mxu0 %v4068_v8 }
 0x768   : > { %2934 = vmatpush3.bf16.msra.mxu0 %v3265_v19 }
 0x769   : > { %2947 = vmatprep.subr.bf16.mxu0 %v4068_v8 }
 0x801   : > { %v1445_v20 = vpop.f32.mrb[8].mxu1 }
 0x802   : > { %v2929_v22 = vpop.f32.mrb[9].mxu1  ;;  %1452 = vrot.lane.b32.xlu1 %v1445_v20, %s4072_s3 }
 0x803   : > { %v1448_v23 = vpop.f32.mrb[10].mxu1 }
 0x804   : > { %v2930_v24 = vpop.f32.mrb[11].mxu1 }
 0x836   : > { %v1396_v25 = vpop.f32.mrb[8].mxu0 }
 0x837   : > { %v2923_v26 = vpop.f32.mrb[9].mxu0 }
 0x838   : > { %v1399_v27 = vpop.f32.mrb[10].mxu0  ;;  %v3272_v26 = vld [vmem:[#allocation13 + $0x10] sm:$0xff]  }
 0x839   : > { %v2924_v28 = vpop.f32.mrb[11].mxu0  ;;  %v3273_v27 = vld [vmem:[#allocation13 + $0x18] sm:$0xff]  }
 0x83a   : > { %v2813_v28 = vld [vmem:[#allocation17 + $0x1] ss:$0 sm:$0xff] }
 0x874   : > { %v1453_v29 = vpop.permute.xlu1 %1452 }
 0x875   : > { %v1455_v30 = vsel %vm1230_vm2, %v1396_v25, %v1453_v29 }
 0x876   : > { %v1456_v31 = vpack.c.bf16 %v1455_v30, %v1455_v30 }
 0x878   : > { %2936 = vmatmul.mubr.msk.bf16.vlgmr.msra.gmra.mrb[12].mxu0 %vm1072_vm0, %v1456_v31 }
 0x879   : > { %2951 = vmatprep.mubr.msk.bf16.mxu0 %vm4069_vm1, %v4068_v8  ;;  %2948 = vmatpush3.bf16.msra.mxu0 %v3268_v49 }
 0x87a   : > { %2949 = vmatprep.subr.bf16.mxu0 %v4068_v8 }
 0x87d   : > { %2950 = vmatpush3.bf16.msra.mxu0 %v3269_v59 }
 0x87e   : > { %2963 = vmatprep.subr.bf16.mxu0 %v4068_v8 }
 0x94b   : > { %v1510_v33 = vpop.f32.mrb[12].mxu0 }
 0x94c   : > { %v1511_v34 = vadd.f32 %v2793_v32, %v1510_v33  ;;  %v2937_v35 = vpop.f32.mrb[13].mxu0 }
 0x94d   : > { %v1513_v36 = vpop.f32.mrb[14].mxu0 }
 0x94e   : > { %v2938_v37 = vpop.f32.mrb[15].mxu0  ;;  %v1516_v38 = vadd.f32 %v1511_v34, %v4839_v21 }
 0x950   : > { %v1517_v39 = vsel %vm1072_vm0, %v1516_v38, 0.0 }
 0x951   : > { %1518 = vadd.xlane.f32.xlu1 %v1517_v39 }
 0x9de   : > { %v1519_v40 = vpop.xlane.xlu1 %1518 }
 0x9df   : > { %v1520_v41 = vmul.f32 0.03125, %v1519_v40  ;;  %v2808_v40 = vld [vmem:[#allocation11 + $0x1] ss:$0 sm:$0xff] }
 0x9e1   : > { %v1521_v42 = vsub.f32 %v1516_v38, %v1520_v41  ;;  %v2807_v38 = vld [vmem:[#allocation10 + $0x1] ss:$0 sm:$0xff] }
 0x9e3   : > { %v1522_v43 = vmul.f32 %v1521_v42, %v1521_v42 }
 0x9e5   : > { %v1523_v44 = vsel %vm1072_vm0, %v1522_v43, 0.0 }
 0x9e6   : > { %1524 = vadd.xlane.f32.xlu0 %v1523_v44 }
 0x9fc   : > { %1664 = vperm.xlu0 %3259, %v1037_v60  }
 0xa73   : > { %v1525_v21 = vpop.xlane.xlu0 %1524 }
 0xa74   : > { %v1526_v50 = vmul.f32 0.03125, %v1525_v21 }
 0xa76   : > { %v1527_v51 = vadd.f32 1e-08, %v1526_v50  ;;  %v2809_v50 = vld [vmem:[#allocation14 + $0x1] ss:$0 sm:$0xff] }
 0xa78   : > { %3290 = vrsqrt.f32 %v1527_v51 }
 0xa7b   : > { %v4910_v14 = vpop.permute.xlu0 %1664 }
 0xa82   : > { %v3291_v52 = vpop.eup %3290 }
 0xa83   : > { %v1529_v54 = vmul.f32 %v3291_v52, %v1521_v42 }
 0xa85   : > { %v1534_v56 = vmul.f32 %v2797_v53, %v1529_v54 }
 0xa87   : > { %v1539_v57 = vadd.f32 %v2798_v55, %v1534_v56 }
 0xa89   : > { %v1540_v58 = vpack.c.bf16 %v1539_v57, %v1539_v57 }
 0xa8b   : > { %2944 = vmatmul.mubr.msk.bf16.vlgmr.msra.gmra.mrb[12].mxu1 %vm1072_vm0, %v1540_v58 }
 0xa8c   : > { %2959 = vmatprep.mubr.msk.bf16.mxu1 %vm4069_vm1, %v4068_v8  ;;  %2956 = vmatpush3.bf16.msra.mxu1 %v3272_v26 }
 0xa8d   : > { %2957 = vmatprep.subr.bf16.mxu1 %v4068_v8 }
 0xa90   : > { %2958 = vmatpush3.bf16.msra.mxu1 %v3273_v27 }
 0xa91   : > { %2971 = vmatprep.subr.bf16.mxu1 %v4068_v8 }
 0xb5e   : > { %v1594_v63 = vpop.f32.mrb[12].mxu1 }
 0xb5f   : > { %v1595_v0 = vadd.f32 %v2799_v62, %v1594_v63  ;;  %v2945_v1 = vpop.f32.mrb[13].mxu1 }
 0xb60   : > { %v1597_v2 = vpop.f32.mrb[14].mxu1 }
 0xb61   : > { %v1600_v3 = vmax.f32 %v1595_v0, 0.0  ;;  %v2946_v4 = vpop.f32.mrb[15].mxu1 }
 0xb63   : > { %v1601_v5 = vpack.c.bf16 %v1600_v3, %v1600_v3 }
 0xb65   : > { %2952 = vmatmul.mubr.msk.bf16.vlgmr.msra.gmra.mrb[16].mxu0 %vm1072_vm0, %v1601_v5 }
 0xb66   : > { %2967 = vmatprep.mubr.msk.bf16.mxu0 %vm4069_vm1, %v4068_v8  ;;  %2964 = vmatpush3.bf16.msra.mxu0 %v3270_v6 }
 0xb67   : > { %2965 = vmatprep.subr.bf16.mxu0 %v4068_v8 }
 0xb6a   : > { %2966 = vmatpush3.bf16.msra.mxu0 %v3271_v7 }
 0xb6b   : > { %2977 = vmatprep.subr.bf16.mxu0 %v4068_v8 }
 0xc38   : > { %v1655_v10 = vpop.f32.mrb[16].mxu0 }
 0xc39   : > { %v1656_v11 = vadd.f32 %v2803_v9, %v1655_v10  ;;  %v2953_v12 = vpop.f32.mrb[17].mxu0 }
 0xc3a   : > { %v1658_v13 = vpop.f32.mrb[18].mxu0 }
 0xc3b   : > { %v1661_v15 = vadd.f32 %v1656_v11, %v1539_v57  ;;  %v2954_v16 = vpop.f32.mrb[19].mxu0 }
 0xc3d   : > { %v1667_v17 = vmul.f32 %v4910_v14, %v1661_v15 }
 0xc3f   : > { %v1786_v18 = vpack.c.bf16 %v1667_v17, %v1667_v17  ;;  %v1702_v19 = vsel %vm1072_vm0, %v1667_v17, 0.0 }
 0xc40   : > { %1703 = vadd.xlane.f32.xlu1 %v1702_v19 }
 0xc41   : > { %2968 = vmatmul.mubr.msk.bf16.vlgmr.msra.gmra.mrb[20].mxu0 %vm1072_vm0, %v1786_v18 }
 0xc42   : > { %2979 = vmatprep.mubr.msk.bf16.mxu0 %vm4069_vm1, %v4068_v8 }
 0xccd   : > { %v1704_v20 = vpop.xlane.xlu1 %1703 }
 0xcce   : > { %v1705_v22 = vmul.f32 0.03125, %v1704_v20 }
 0xcd0   : > { %v1706_v23 = vsub.f32 %v1667_v17, %v1705_v22 }
 0xcd2   : > { %v1707_v24 = vmul.f32 %v1706_v23, %v1706_v23 }
 0xcd4   : > { %v1708_v25 = vsel %vm1072_vm0, %v1707_v24, 0.0 }
 0xcd5   : > { %1709 = vadd.xlane.f32.xlu1 %v1708_v25 }
 0xd14   : > { %v1840_v29 = vpop.f32.mrb[20].mxu0 }
 0xd15   : > { %v1841_v30 = vadd.f32 %v2813_v28, %v1840_v29  ;;  %v2969_v31 = vpop.f32.mrb[21].mxu0 }
 0xd16   : > { %v1843_v32 = vpop.f32.mrb[22].mxu0  ;;  %v3274_v31 = vld [vmem:[#allocation19 + $0x10] sm:$0xff]  }
 0xd17   : > { %1853 = vrot.lane.b32.xlu1 %v1841_v30, %s4070_s0  ;;  %v2970_v33 = vpop.f32.mrb[23].mxu0  ;;  %v1856_v42 = vpack.c.bf16 %v1841_v30, %v1841_v30  ;;  %v3275_v32 = vld [vmem:[#allocation19 + $0x18] sm:$0xff]  }
 0xd19   : > { %v1862_v47 = vsel %vm1230_vm2, %v1856_v42, 0 }
 0xd62   : > { %v1710_v34 = vpop.xlane.xlu1 %1709 }
 0xd63   : > { %v1711_v35 = vmul.f32 0.03125, %v1710_v34 }
 0xd65   : > { %v1712_v36 = vadd.f32 1e-08, %v1711_v35 }
 0xd67   : > { %3292 = vrsqrt.f32 %v1712_v36 }
 0xd71   : > { %v3293_v37 = vpop.eup %3292 }
 0xd72   : > { %v1714_v39 = vmul.f32 %v3293_v37, %v1706_v23 }
 0xd74   : > { %v1719_v41 = vmul.f32 %v2807_v38, %v1714_v39 }
 0xd76   : > { %v4921_v43 = vadd.f32 %v2808_v40, %v1719_v41 }
 0xd78   : > { %v1725_v44 = vpack.c.bf16 %v4921_v43, %v4921_v43 }
 0xd7a   : > { %2960 = vmatmul.mubr.msk.bf16.vlgmr.msra.gmra.mrb[16].mxu1 %vm1072_vm0, %v1725_v44 }
 0xd7b   : > { %2972 = vmatpush3.bf16.xpose.msra.mxu1 %v1862_v47  ;;  %2973 = vmatprep.mubr.msk.bf16.mxu1 %vm4069_vm1, %v4068_v8  ;;  %v2821_v47 = vld [vmem:[#allocation20 + $0x1] ss:$0 sm:$0xff] }
 0xd7c   : > { %2983 = vmatprep.subr.bf16.mxu1 %v4068_v8 }
 0xd89   : > { %v1854_v48 = vpop.permute.xlu1 %1853 }
 0xd8a   : > { %v1857_v49 = vpack.c.bf16 %v1854_v48, %v1854_v48 }
 0xd8c   : > { %v1908_v21 = vsel %vm1230_vm2, %v1857_v49, 0 }
 0xd8d   : > { %2978 = vmatpush3.bf16.xpose.msra.mxu0 %v1908_v21 }
 0xd8e   : > { %2989 = vmatprep.subr.bf16.mxu0 %v4068_v8 }
 0xe4d   : > { %v1779_v51 = vpop.f32.mrb[16].mxu1 }
 0xe4e   : > { %v1780_v52 = vadd.f32 %v2809_v50, %v1779_v51  ;;  %v2961_v53 = vpop.f32.mrb[17].mxu1 }
 0xe4f   : > { %v1782_v54 = vpop.f32.mrb[18].mxu1 }
 0xe50   : > { %v1785_v55 = vmul.f32 0.25, %v1780_v52  ;;  %v2962_v56 = vpop.f32.mrb[19].mxu1 }
 0xe52   : > { %v1850_v57 = vpack.c.bf16 %v1785_v55, %v1785_v55  ;;  %1847 = vrot.lane.b32.xlu0 %v1785_v55, %s4070_s0 }
 0xe54   : > { %2974 = vmatmul.mubr.msk.bf16.vlgmr.msra.gmra.mrb[20].mxu1 %vm1230_vm2, %v1850_v57 }
 0xe55   : > { %2985 = vmatprep.mubr.msk.bf16.mxu1 %vm4069_vm1, %v4068_v8 }
 0xec4   : > { %v1848_v58 = vpop.permute.xlu0 %1847 }
 0xec5   : > { %v1851_v59 = vpack.c.bf16 %v1848_v58, %v1848_v58 }
 0xec7   : > { %2980 = vmatmul.mubr.msk.bf16.vlgmr.msra.gmra.mrb[24].mxu0 %vm1230_vm2, %v1851_v59  ;;  %v3276_v59 = vld [vmem:[#allocation25 + $0x10] sm:$0xff]  }
 0xec8   : > { %2991 = vmatprep.mubr.msk.bf16.mxu0 %vm4069_vm1, %v4068_v8 }
 0xf27   : > { %v1898_v60 = vpop.f32.mrb[20].mxu1 }
 0xf28   : > { %v1950_v61 = vsel %vm1042_vm3, %v1898_v60, -1e+30  ;;  %v2975_v62 = vpop.f32.mrb[21].mxu1  ;;  %v3277_v60 = vld [vmem:[#allocation25 + $0x18] sm:$0xff]  }
 0xf29   : > { %v1901_v63 = vpop.f32.mrb[22].mxu1  ;;  %v1952_v0 = vsel %vm1327_vm4, %v1950_v61, -inf }
 0xf2a   : > { %1953 = vmax.xlane.f32.xlu1 %v1952_v0  ;;  %v2976_v1 = vpop.f32.mrb[23].mxu1 }
 0xf2b   : > { %v2825_v1 = vld [vmem:[#allocation22 + $0x1] ss:$0 sm:$0xff] }
 0xf9a   : > { %v1944_v2 = vpop.f32.mrb[24].mxu0 }
 0xf9b   : > { %v1951_v3 = vsel %vm1042_vm3, %v1944_v2, -1e+30  ;;  %v2981_v4 = vpop.f32.mrb[25].mxu0 }
 0xf9c   : > { %v1947_v5 = vpop.f32.mrb[26].mxu0  ;;  %v1955_v6 = vsel %vm1327_vm4, %v1951_v3, -inf }
 0xf9d   : > { %1956 = vmax.xlane.f32.xlu0 %v1955_v6  ;;  %v2982_v7 = vpop.f32.mrb[27].mxu0 }
 0xf9e   : > { %v3279_v7 = vld [vmem:[#allocation28 + $0x18] sm:$0xff]  }
 0xfb7   : > { %v1954_v9 = vpop.xlane.xlu1 %1953 }
 0xfb8   : > { %v1958_v10 = vsub.f32 %v1950_v61, %v1954_v9  ;;  %v3278_v61 = vld [vmem:[#allocation28 + $0x10] sm:$0xff]   ;;  %v2827_v9 = vld [vmem:[#allocation26 + $0x1] ss:$0 sm:$0xff] }
 0xfba   : > { %v1960_v11 = vmul.f32 1.442695, %v1958_v10 }
 0xfbc   : > { %3294 = vpow2.f32 %v1960_v11 }
 0xfc6   : > { %v3295_v12 = vpop.eup %3294 }
 0xfc7   : > { %v1964_v13 = vsel %vm1327_vm4, %v3295_v12, 0.0 }
 0xfc8   : > { %1965 = vadd.xlane.f32.xlu1 %v1964_v13 }
 0xfd9   : > { %1977 = vrot.lane.b32.xlu1 %v1856_v42, %s4071_s6 }
0x102a   : > { %v1957_v15 = vpop.xlane.xlu0 %1956 }
0x102b   : > { %v1959_v16 = vsub.f32 %v1951_v3, %v1957_v15  ;;  %v2826_v3 = vld [vmem:[#allocation23 + $0x1] ss:$0 sm:$0xff] }
0x102d   : > { %v1962_v45 = vmul.f32 1.442695, %v1959_v16 }
0x102f   : > { %3296 = vpow2.f32 %v1962_v45  ;;  %v2831_v45 = vld [vmem:[#allocation29 + $0x1] ss:$0 sm:$0xff] }
0x1039   : > { %v3297_v46 = vpop.eup %3296 }
0x103a   : > { %v1967_v17 = vsel %vm1327_vm4, %v3297_v46, 0.0 }
0x103b   : > { %1968 = vadd.xlane.f32.xlu0 %v1967_v17 }
0x1051   : > { %2026 = vrot.lane.b32.xlu0 %v1857_v49, %s4071_s6 }
0x1055   : > { %v1966_v18 = vpop.xlane.xlu1 %1965 }
0x1056   : > { %3298 = vrcp.f32 %v1966_v18 }
0x1059   : > { %v1978_v19 = vpop.permute.xlu1 %1977 }
0x105a   : > { %v1983_v20 = vsel %vm1358_vm5, %v1978_v19, 0 }
0x105b   : > { %2984 = vmatpush3.bf16.msra.mxu1 %v1983_v20 }
0x105c   : > { %2995 = vmatprep.subr.bf16.mxu1 %v4068_v8 }
0x1060   : > { %v3299_v22 = vpop.eup %3298 }
0x1061   : > { %v1972_v23 = vmul.f32 %v3299_v22, %v3295_v12 }
0x1063   : > { %v1974_v24 = vpack.c.bf16 %v1972_v23, %v1972_v23 }
0x1065   : > { %2986 = vmatmul.mubr.msk.bf16.vlgmr.msra.gmra.mrb[24].mxu1 %vm1327_vm4, %v1974_v24 }
0x1066   : > { %2999 = vmatprep.mubr.msk.bf16.mxu1 %vm4069_vm1, %v4068_v8  ;;  %2996 = vmatpush3.bf16.msra.mxu1 %v3274_v31 }
0x1067   : > { %2997 = vmatprep.subr.bf16.mxu1 %v4068_v8 }
0x106a   : > { %2998 = vmatpush3.bf16.msra.mxu1 %v3275_v32 }
0x106b   : > { %3011 = vmatprep.subr.bf16.mxu1 %v4068_v8 }
0x10c8   : > { %v1969_v25 = vpop.xlane.xlu0 %1968 }
0x10c9   : > { %3300 = vrcp.f32 %v1969_v25 }
0x10cc   : > { %v2027_v26 = vpop.permute.xlu0 %2026 }
0x10cd   : > { %v2032_v27 = vsel %vm1358_vm5, %v2027_v26, 0 }
0x10ce   : > { %2990 = vmatpush3.bf16.msra.mxu0 %v2032_v27 }
0x10cf   : > { %3003 = vmatprep.subr.bf16.mxu0 %v4068_v8 }
0x10d3   : > { %v3301_v28 = vpop.eup %3300 }
0x10d4   : > { %v1973_v29 = vmul.f32 %v3301_v28, %v3297_v46 }
0x10d6   : > { %v1975_v30 = vpack.c.bf16 %v1973_v29, %v1973_v29 }
0x10d8   : > { %2992 = vmatmul.mubr.msk.bf16.vlgmr.msra.gmra.mrb[28].mxu0 %vm1327_vm4, %v1975_v30 }
0x10d9   : > { %3007 = vmatprep.mubr.msk.bf16.mxu0 %vm4069_vm1, %v4068_v8  ;;  %3004 = vmatpush3.bf16.msra.mxu0 %v3276_v59 }
0x10da   : > { %3005 = vmatprep.subr.bf16.mxu0 %v4068_v8 }
0x10dd   : > { %3006 = vmatpush3.bf16.msra.mxu0 %v3277_v60 }
0x1138   : > { %v2019_v33 = vpop.f32.mrb[24].mxu1 }
0x1139   : > { %v2987_v34 = vpop.f32.mrb[25].mxu1 }
0x113a   : > { %v2022_v35 = vpop.f32.mrb[26].mxu1 }
0x113b   : > { %v2988_v36 = vpop.f32.mrb[27].mxu1  ;;  %v2836_v35 = vld [vmem:[#allocation32] ss:$0 sm:$0xff] }
0x11ab   : > { %v2068_v37 = vpop.f32.mrb[28].mxu0 }
0x11ac   : > { %2075 = vrot.lane.b32.xlu0 %v2068_v37, %s4072_s3  ;;  %v2993_v38 = vpop.f32.mrb[29].mxu0  ;;  %v2323_v37 = vld [vmem:[%s885_s8] sm:$0xff] }
0x11ad   : > { %v2071_v39 = vpop.f32.mrb[30].mxu0  ;;  %v2316_v38 = vld [vmem:[%s876_s7] sm:$0xff] }
0x11ae   : > { %v2994_v40 = vpop.f32.mrb[31].mxu0 }
0x121e   : > { %v2076_v41 = vpop.permute.xlu0 %2075 }
0x121f   : > { %v2078_v42 = vsel %vm1230_vm2, %v2019_v33, %v2076_v41 }
0x1220   : > { %v2079_v44 = vpack.c.bf16 %v2078_v42, %v2078_v42 }
0x1222   : > { %3000 = vmatmul.mubr.msk.bf16.vlgmr.msra.gmra.mrb[28].mxu1 %vm1072_vm0, %v2079_v44 }
0x1223   : > { %3015 = vmatprep.mubr.msk.bf16.mxu1 %vm4069_vm1, %v4068_v8  ;;  %3012 = vmatpush3.bf16.msra.mxu1 %v3278_v61 }
0x1224   : > { %3013 = vmatprep.subr.bf16.mxu1 %v4068_v8 }
0x1227   : > { %3014 = vmatpush3.bf16.msra.mxu1 %v3279_v7 }
0x12f5   : > { %v2133_v48 = vpop.f32.mrb[28].mxu1 }
0x12f6   : > { %v2134_v49 = vadd.f32 %v2821_v47, %v2133_v48  ;;  %v3001_v21 = vpop.f32.mrb[29].mxu1 }
0x12f7   : > { %v2136_v50 = vpop.f32.mrb[30].mxu1 }
0x12f8   : > { %v3002_v51 = vpop.f32.mrb[31].mxu1  ;;  %v2139_v52 = vadd.f32 %v2134_v49, %v4921_v43 }
0x12fa   : > { %v2140_v53 = vsel %vm1072_vm0, %v2139_v52, 0.0 }
0x12fb   : > { %2141 = vadd.xlane.f32.xlu0 %v2140_v53 }
0x1388   : > { %v2142_v54 = vpop.xlane.xlu0 %2141 }
0x1389   : > { %v2143_v55 = vmul.f32 0.03125, %v2142_v54 }
0x138b   : > { %v2144_v56 = vsub.f32 %v2139_v52, %v2143_v55 }
0x138d   : > { %v2145_v57 = vmul.f32 %v2144_v56, %v2144_v56 }
0x138f   : > { %v2146_v58 = vsel %vm1072_vm0, %v2145_v57, 0.0 }
0x1390   : > { %2147 = vadd.xlane.f32.xlu1 %v2146_v58 }
0x141d   : > { %v2148_v43 = vpop.xlane.xlu1 %2147 }
0x141e   : > { %v2149_v62 = vmul.f32 0.03125, %v2148_v43 }
0x1420   : > { %v2150_v63 = vadd.f32 1e-08, %v2149_v62 }
0x1422   : > { %3302 = vrsqrt.f32 %v2150_v63 }
0x142c   : > { %v3303_v0 = vpop.eup %3302 }
0x142d   : > { %v2152_v2 = vmul.f32 %v3303_v0, %v2144_v56 }
0x142f   : > { %v2157_v4 = vmul.f32 %v2825_v1, %v2152_v2 }
0x1431   : > { %v2162_v5 = vadd.f32 %v2826_v3, %v2157_v4 }
0x1433   : > { %v2163_v6 = vpack.c.bf16 %v2162_v5, %v2162_v5 }
0x1435   : > { %3008 = vmatmul.mubr.msk.bf16.vlgmr.msra.gmra.mrb[32].mxu0 %vm1072_vm0, %v2163_v6 }
0x1508   : > { %v2217_v10 = vpop.f32.mrb[32].mxu0 }
0x1509   : > { %v2218_v11 = vadd.f32 %v2827_v9, %v2217_v10  ;;  %v3009_v12 = vpop.f32.mrb[33].mxu0 }
0x150a   : > { %v2220_v8 = vpop.f32.mrb[34].mxu0 }
0x150b   : > { %v2223_v13 = vmax.f32 %v2218_v11, 0.0  ;;  %v3010_v15 = vpop.f32.mrb[35].mxu0 }
0x150d   : > { %v2224_v16 = vpack.c.bf16 %v2223_v13, %v2223_v13 }
0x150f   : > { %3016 = vmatmul.mubr.msk.bf16.vlgmr.msra.gmra.mrb[32].mxu1 %vm1072_vm0, %v2224_v16 }
0x15e2   : > { %v2278_v46 = vpop.f32.mrb[32].mxu1 }
0x15e3   : > { %v2279_v17 = vadd.f32 %v2831_v45, %v2278_v46  ;;  %v3017_v18 = vpop.f32.mrb[33].mxu1 }
0x15e4   : > { %v2281_v19 = vpop.f32.mrb[34].mxu1 }
0x15e5   : > { %v2284_v20 = vadd.f32 %v2279_v17, %v2162_v5  ;;  %v3018_v22 = vpop.f32.mrb[35].mxu1 }
0x15e7   : > { %v2285_v23 = vmul.f32 %v2284_v20, %v4910_v14  ;;  %v2835_v14 = vld [vmem:[#allocation31] ss:$0 sm:$0xff] }
0x15e9   : > { %v2288_v24 = vsel %vm1072_vm0, %v2285_v23, 0.0 }
0x15ea   : > { %2289 = vadd.xlane.f32.xlu0 %v2288_v24 }
0x1677   : > { %v2290_v25 = vpop.xlane.xlu0 %2289 }
0x1678   : > { %v2291_v26 = vmul.f32 0.03125, %v2290_v25 }
0x167a   : > { %v2292_v27 = vsub.f32 %v2285_v23, %v2291_v26 }
0x167c   : > { %v2293_v28 = vmul.f32 %v2292_v27, %v2292_v27 }
0x167e   : > { %v2294_v29 = vsel %vm1072_vm0, %v2293_v28, 0.0 }
0x167f   : > { %2295 = vadd.xlane.f32.xlu0 %v2294_v29 }
0x170c   : > { %v2296_v30 = vpop.xlane.xlu0 %2295 }
0x170d   : > { %v2297_v31 = vmul.f32 0.03125, %v2296_v30 }
0x170f   : > { %v2298_v32 = vadd.f32 1e-08, %v2297_v31 }
0x1711   : > { %3304 = vrsqrt.f32 %v2298_v32 }
0x171b   : > { %v3305_v33 = vpop.eup %3304 }
0x171c   : > { %v2300_v34 = vmul.f32 %v3305_v33, %v2292_v27 }
0x171e   : > { %v2307_v36 = vmul.f32 %v2835_v14, %v2300_v34 }
0x1720   : > { %v2314_v39 = vadd.f32 %v2836_v35, %v2307_v36 }
0x1722   : > { %v2324_v40 = vmul.f32 %v2323_v37, %v2314_v39  ;;  %v2317_v41 = vmul.f32 %v2316_v38, %v2314_v39  ;;  %2315 = vst.msk [vmem:[%s1020_s25] sm:$0xff] %vm1072_vm0, %v2314_v39 }
0x1724   : > { %v2325_v42 = vsel %vm1072_vm0, %v2324_v40, 0.0  ;;  %v2318_v44 = vsel %vm1072_vm0, %v2317_v41, 0.0 }
0x1725   : > { %2326 = vadd.xlane.f32.xlu0 %v2325_v42  ;;  %2319 = vadd.xlane.f32.xlu1 %v2318_v44 }
0x1726   : > { %3887 = shalt.err (!%p3884_p5)
}
0x1727   : > { %s3888_s23 = scalar_lea.hbm %s4993_s26, 128  ;;  %s3892_s10 = scalar_lea.hbm %s5248_s24, 256 }
0x1728   : > { %p3889_p0 = scmp.ne.s32.totalorder %s4993_s26, %s3888_s23  ;;  %p3893_p9 = scmp.lt.u32.totalorder %s4993_s26, %s5248_s24 }
0x1729   : > { %p3894_p8 = scmp.lt.u32.totalorder %s3892_s10, %s3888_s23  ;;  %p3896_p6 = scmp.lt.u32.totalorder %s3888_s23, %s4993_s26 }
0x172a   : > { %p3890_p13 = pnand %p3889_p0, %p5249_p11 }
0x172b   : > { %p3895_p1 = por %p3894_p8, %p3893_p9 }
0x172c   : > { %p3891_p10 = pneg %p3890_p13 }
0x172d   : > { %p3897_p12 = por %p3896_p6, %p3895_p1 }
0x172f   : > { %p3898_p4 = pnand %p3897_p12, %p3891_p10 }
0x1731   : > { %3901 = shalt.err (!%p3898_p4)
}
0x1732   : > { %3091 = dma.vmem_to_hbm [thread:$0]  (%p5249_p11), %s2354_s11, 128, %s4993_s26, %s2330_s14   ;;  %vm2321_vm6 = vcmask 7168  }
0x1733   : > { %s1027_s6 = scalar_lea.vmem [#allocation35], %s4762_s15  ;;  %s1034_s25 = scalar_lea.vmem [#allocation37], %s4762_s15 }
0x1734   : > { %s2366_s3 = sshll.u32 %s1027_s6, 4  ;;  %s2379_s19 = sshll.u32 %s1034_s25, 4  ;;  %s5021_s3 = int_to_ptr.vmem [resolvable:$true] %s2366_s3  ;;  %s5029_s19 = int_to_ptr.vmem [resolvable:$true] %s2379_s19 }
0x1735   : > { %s5250_s17 = sld [smem:[#allocation78_spill]]  ;;  %s5251_s11 = sld [smem:[#allocation79_spill]] }
0x1736   : > { %s2335_s15 = scalar_lea.sflag [#allocation36], %s4771_s27  ;;  %s3902_s23 = scalar_lea.vmem %s5021_s3, 128 }
0x1737   : > { %p3903_p7 = scmp.ne.s32.totalorder %s5021_s3, %s3902_s23  ;;  %s4075_s13 = smov [#allocation35]  }
0x1738   : > { %s3906_s7 = sshll.u32 %s4075_s13, 4  ;;  %s3907_s7 = int_to_ptr.vmem [resolvable:$false] %s3906_s7 }
0x1739   : > { %p3904_p2 = pnand %p3903_p7, %p5249_p11  ;;  %s3908_s10 = scalar_lea.vmem %s3907_s7, 256 }
0x173a   : > { %p3909_p5 = scmp.lt.s32.totalorder %s5021_s3, %s3907_s7  ;;  %p3910_p0 = scmp.lt.s32.totalorder %s3908_s10, %s3902_s23 }
0x173b   : > { %s5019_s12 = scalar_lea.hbm %s5250_s17, %s4987_s18  ;;  %s5027_s14 = scalar_lea.hbm %s5251_s11, %s4987_s18 }
0x173c   : > { %p3905_p3 = pneg %p3904_p2  ;;  %p3911_p13 = por %p3910_p0, %p3909_p5 }
0x173e   : > { %p3912_p10 = pnand %p3911_p13, %p3905_p3 }
0x17b2   : > { %v2327_v47 = vpop.xlane.xlu0 %2326  ;;  %v2320_v48 = vpop.xlane.xlu1 %2319 }
0x17b3   : > { %2328 = vst.msk [vmem:[%s1034_s25] sm:$0xff] %vm2321_vm6, %v2327_v47  ;;  %2322 = vst.msk [vmem:[%s1027_s6] sm:$0xff] %vm2321_vm6, %v2320_v48 }
0x17b4   : > { %3915 = shalt.err (!%p3912_p10)
}
0x17b5   : > { %s3916_s18 = scalar_lea.hbm %s5019_s12, 128  ;;  %s3920_s6 = scalar_lea.hbm %s5250_s17, 256 }
0x17b6   : > { %p3917_p9 = scmp.ne.s32.totalorder %s5019_s12, %s3916_s18  ;;  %p3921_p6 = scmp.lt.u32.totalorder %s5019_s12, %s5250_s17 }
0x17b7   : > { %p3922_p12 = scmp.lt.u32.totalorder %s3920_s6, %s3916_s18  ;;  %p3924_p7 = scmp.lt.u32.totalorder %s3916_s18, %s5019_s12 }
0x17b8   : > { %p3918_p8 = pnand %p3917_p9, %p5249_p11 }
0x17b9   : > { %p3923_p4 = por %p3922_p12, %p3921_p6 }
0x17ba   : > { %p3919_p1 = pneg %p3918_p8 }
0x17bb   : > { %p3925_p2 = por %p3924_p7, %p3923_p4 }
0x17bd   : > { %p3926_p3 = pnand %p3925_p2, %p3919_p1 }
0x17bf   : > { %3929 = shalt.err (!%p3926_p3)
}
0x17c0   : > { %3092 = dma.vmem_to_hbm [thread:$0]  (%p5249_p11), %s5021_s3, 128, %s5019_s12, %s2335_s15  }
0x17c1   : > { %s3930_s4 = scalar_lea.vmem %s5029_s19, 128  ;;  %s4076_s1 = smov [#allocation37]  }
0x17c2   : > { %p3931_p5 = scmp.ne.s32.totalorder %s5029_s19, %s3930_s4  ;;  %s3934_s26 = sshll.u32 %s4076_s1, 4  ;;  %s3935_s26 = int_to_ptr.vmem [resolvable:$false] %s3934_s26 }
0x17c3   : > { %s3936_s23 = scalar_lea.vmem %s3935_s26, 256  ;;  %p3937_p10 = scmp.lt.s32.totalorder %s5029_s19, %s3935_s26 }
0x17c4   : > { %p3932_p0 = pnand %p3931_p5, %p5249_p11  ;;  %p3938_p9 = scmp.lt.s32.totalorder %s3936_s23, %s3930_s4 }
0x17c6   : > { %p3933_p13 = pneg %p3932_p0  ;;  %p3939_p8 = por %p3938_p9, %p3937_p10 }
0x17c8   : > { %p3940_p1 = pnand %p3939_p8, %p3933_p13 }
0x17ca   : > { %3943 = shalt.err (!%p3940_p1)
}
0x17cb   : > { %s3944_s3 = scalar_lea.hbm %s5027_s14, 128  ;;  %s3948_s7 = scalar_lea.hbm %s5251_s11, 256 }
0x17cc   : > { %p3945_p6 = scmp.ne.s32.totalorder %s5027_s14, %s3944_s3  ;;  %p3949_p7 = scmp.lt.u32.totalorder %s5027_s14, %s5251_s11 }
0x17cd   : > { %p3950_p2 = scmp.lt.u32.totalorder %s3948_s7, %s3944_s3  ;;  %p3952_p5 = scmp.lt.u32.totalorder %s3944_s3, %s5027_s14 }
0x17ce   : > { %p3946_p12 = pnand %p3945_p6, %p5249_p11 }
0x17cf   : > { %p3951_p3 = por %p3950_p2, %p3949_p7 }
0x17d0   : > { %p3947_p4 = pneg %p3946_p12 }
0x17d1   : > { %p3953_p0 = por %p3952_p5, %p3951_p3 }
0x17d3   : > { %p3954_p13 = pnand %p3953_p0, %p3947_p4 }
0x17d5   : > { %3957 = shalt.err (!%p3954_p13)
}
0x17d6   : > { %3093 = dma.vmem_to_hbm [thread:$0]  (%p5249_p11), %s5029_s19, 128, %s5027_s14, %s2335_s15  }
0x17d7 PF: > { %s5252_s8 = sld [smem:[#allocation52_spill]]  ;;  %s5253_s0 = sld [smem:[#allocation56_spill]] }
0x17d8   : > { %p5255_p9 = scmp.ge.s32.totalorder %s4044_s30, 2 }
0x17dd   : > { %s2391_s6 = sand.u32 1, %s5252_s8   ;;  %p5254_p10 = scmp.ne.s32.totalorder %s5253_s0, 0 }
0x17de   : > { %s2392_s25 = scalar_lea.sflag [#allocation4], %s2391_s6 }
0x17df   : > { %p3160_p8 = pnand %p5255_p9, %p5254_p10 }
0x17e1   : > { %4023 = dma.done.wait (!%p3160_p8), %s2392_s25, 128  }
0x17e2   : > { %4025 = vsyncadd (!%p3160_p8), %s2392_s25, 4294967168  ;;  %s5256_s9 = sadd.s32 4294967294, %s4044_s30  }
0x17e3   : > { %s2400_s4 = sand.u32 1, %s5256_s9  }
0x17e4   : > { %s2401_s2 = scalar_lea.sflag [#allocation36], %s2400_s4 }
0x17e5   : > { %4027 = dma.done.wait (!%p3160_p8), %s2401_s2, 256  }
0x17e6   : > { %4029 = vsyncadd (!%p3160_p8), %s2401_s2, 4294967040  ;;  %s5257_s30 = sld [smem:[#allocation54_spill]]  ;;  %s5258_s27 = sld [smem:[#allocation55_spill]] }
0x17e7   : > { %s5259_s3 = smov %s4036_s28  ;;  %s5260_s28 = smov %s4040_s29 }
0x17ec   : > { %p53_p11 = scmp.ge.s32.totalorder %s5257_s30, 4   ;;  %s5261_s29 = smov %s5258_s27 }
0x17ee   :  { %55 = sbr.rel (!%p53_p11) target bundleno = 43 (0x2b), region = 283 }
0x17f5   :  { %2415 = vsyncpa [#allocation3], 1 }
0x17f6   :  { %2417 = vsyncpa [#allocation3 + $0x1], 1 }
0x17f7   :  { %2418 = vsyncpa [#allocation6], 1 }
0x17f8   :  { %2420 = vsyncpa [#allocation6 + $0x1], 1 }
0x17f9   :  { %2421 = vsyncpa [#allocation9], 1 }
0x17fa   :  { %2423 = vsyncpa [#allocation9 + $0x1], 1 }
0x17fb   :  { %2424 = vsyncpa [#allocation12], 1 }
0x17fc   :  { %2425 = vsyncpa [#allocation15], 1 }
0x17fd   :  { %2426 = vsyncpa [#allocation18], 1 }
0x17fe   :  { %2427 = vsyncpa [#allocation21], 1 }
0x17ff   :  { %2428 = vsyncpa [#allocation24], 1 }
0x1800   :  { %2429 = vsyncpa [#allocation27], 1 }
0x1801   :  { %2430 = vsyncpa [#allocation30], 1 }
0x1802   :  { %2431 = vsyncpa [#allocation33], 1 }
0x1803   :  { %2432 = vsyncpa [#allocation4], 1 }
0x1804   :  { %2434 = vsyncpa [#allocation4 + $0x1], 1 }
0x1805   :  { %2435 = vsyncpa [#allocation36], 1 }
0x1806   :  { %2437 = vsyncpa [#allocation36 + $0x1], 1 }

</bundles_post_ra>
